<compile_context>
chip_gen: v7x
topology: tpu7x:2x2x1
jax: 0.10.0
libtpu: 0.0.40
codegen_flags: <defaults>
</compile_context>

<pallas_src>
import functools

import jax
import jax.numpy as jnp
from jax.experimental import pallas as pl
from jax.experimental.pallas import tpu as pltpu


def _round_up(n, m):
    return ((n + m - 1) // m) * m


def _pad_to(x, shape):
    pads = [(0, s - d) for s, d in zip(shape, x.shape)]
    if all(p == (0, 0) for p in pads):
        return x
    return jnp.pad(x, pads)


def _rtn_rnn_kernel(x_ref, u_ref, h0_ref, w_ref, out_ref, h_scratch):
    """One grid step == Tc recurrence steps for one batch block.

    x_ref:     (tb, Tc, Dp)  raw input chunk (for the convex update)
    u_ref:     (tb, Tc, Dp)  precomputed f32 gate input: x @ W_in^T + b_h0
    h0_ref:    (tb, Dp)      initial hidden state for this batch block
    w_ref:     (Dp, Dp)      recurrent weight W_h0^T, bf16
    out_ref:   (tb, Tc, Dp)  per-step hidden states
    h_scratch: (tb, Dp)      f32 hidden-state carry across time blocks
    """
    # Re-initialize the carry at the first time block of every batch block.
    @pl.when(pl.program_id(1) == 0)
    def _():
        h_scratch[...] = h0_ref[...].astype(jnp.float32)

    w = w_ref[...]                      # (Dp, Dp) bf16 recurrent weight
    h = h_scratch[...]                  # (tb, Dp) f32 carry
    tc = x_ref.shape[1]

    # Tc is small and static: compile-time unroll (equivalent to
    # lax.fori_loop(..., unroll=True)); every slice index stays static so all
    # loads/stores are plain static-offset vector ops.
    for i in range(tc):
        x_i = x_ref[:, i, :].astype(jnp.float32)            # (tb, Dp) f32
        u_i = u_ref[:, i, :]                                 # (tb, Dp) f32
        # MXU in bf16 with f32 accumulation; gate math stays in f32.
        pre = jnp.dot(h.astype(jnp.bfloat16), w,
                      preferred_element_type=jnp.float32) + u_i
        z = jax.nn.sigmoid(pre)
        h = (1.0 - z) * h + z * x_i                          # f32 convex update
        out_ref[:, i:i + 1, :] = h[:, None, :].astype(out_ref.dtype)

    h_scratch[...] = h


@functools.partial(jax.jit, static_argnames=("time_block", "batch_block"))
def rtn_rnn_forward(x_btd, hidden_bd, w_in, w_h0, b_h0, *,
                    time_block=16, batch_block=None):
    """RTNRnn forward.

    x_btd: (B, T, D) input sequence, hidden_bd: (B, D) initial hidden.
    w_in, w_h0: (D, D) PyTorch-layout Linear weights (out_features, in_features).
    b_h0: (D,) bias of fc_h0.
    batch_block: rows per batch grid block (multiple of 8).  Default = whole
      (padded) batch.  On v7x set it to half the padded batch to shard the
      recurrence across the 2 TensorCores.
    Returns (outputs (B, T, D), final_hidden (B, D)).
    """
    B, T, D = x_btd.shape
    dtype = x_btd.dtype

    # Hardware-granular padded sizes: lane dim multiple of 128, sublane dims
    # multiples of 8.  Zero padding is inert (zero-padded weights/bias).
    Dp = _round_up(D, 128)
    Bp = _round_up(B, 8)
    Tc = min(time_block, _round_up(T, 8))
    Tp = _round_up(T, Tc)
    tb = Bp if batch_block is None else batch_block
    assert tb % 8 == 0 and Bp % tb == 0, "batch_block must be a multiple of 8 dividing the padded batch"

    x_p = _pad_to(x_btd, (Bp, Tp, Dp))
    h0_p = _pad_to(hidden_bd, (Bp, Dp))
    w_in_t = _pad_to(jnp.transpose(w_in).astype(jnp.float32), (Dp, Dp))
    w_h0_t = _pad_to(jnp.transpose(w_h0).astype(jnp.bfloat16), (Dp, Dp))   # bf16 for the MXU
    b_p = _pad_to(b_h0.astype(jnp.float32), (Dp,))

    # Hoisted input path: one large (Bp*Tp, Dp) x (Dp, Dp) matmul (near-full
    # MXU row utilization) instead of T tiny in-loop matmuls; bias folded in.
    u_p = jnp.dot(x_p.reshape(Bp * Tp, Dp).astype(jnp.float32), w_in_t,
                  precision=jax.lax.Precision.HIGHEST,
                  preferred_element_type=jnp.float32)
    u_p = (u_p + b_p).reshape(Bp, Tp, Dp)

    grid = (Bp // tb, Tp // Tc)

    itemsize = jnp.dtype(dtype).itemsize
    est_vmem = (2 * tb * Tc * Dp * (itemsize + 4 + itemsize)   # x + u(f32) + out, double-buffered
                + 2 * tb * Dp * itemsize                        # h0
                + 2 * Dp * Dp * 2                               # W_h0^T (bf16), double-buffered
                + tb * Dp * 4)                                  # f32 carry scratch
    # Explicit limit, kept under v7x's 64 MiB physical VMEM.
    vmem_limit = int(min(60 << 20, max(32 << 20, 2 * est_vmem + (4 << 20))))

    out_p = pl.pallas_call(
        _rtn_rnn_kernel,
        out_shape=jax.ShapeDtypeStruct((Bp, Tp, Dp), dtype),
        grid_spec=pltpu.PrefetchScalarGridSpec(
            num_scalar_prefetch=0,
            grid=grid,
            in_specs=[
                pl.BlockSpec((tb, Tc, Dp), lambda b, t: (b, t, 0)),   # x chunk
                pl.BlockSpec((tb, Tc, Dp), lambda b, t: (b, t, 0)),   # u chunk (precomputed)
                pl.BlockSpec((tb, Dp), lambda b, t: (b, 0)),          # initial hidden
                pl.BlockSpec((Dp, Dp), lambda b, t: (0, 0)),          # W_h0^T (bf16)
            ],
            out_specs=pl.BlockSpec((tb, Tc, Dp), lambda b, t: (b, t, 0)),
            scratch_shapes=[pltpu.VMEM((tb, Dp), jnp.float32)],       # f32 hidden carry
        ),
        compiler_params=pltpu.CompilerParams(
            dimension_semantics=("parallel", "arbitrary"),   # batch parallel, time sequential
            vmem_limit_bytes=vmem_limit,
        ),
    )(x_p, u_p, h0_p, w_h0_t)

    outputs = out_p[:B, :T, :D]
    h_final = outputs[:, -1]          # final hidden == last per-step hidden
    return outputs, h_final


def _reference(x_btd, hidden, w_in, w_h0, b_h0):
    """Pure-JAX f32 reference mirroring the PyTorch loop."""
    B, T, D = x_btd.shape
    h = hidden.astype(jnp.float32)
    w_h0_t = jnp.transpose(w_h0).astype(jnp.float32)
    w_in_t = jnp.transpose(w_in).astype(jnp.float32)
    outs = []
    for t in range(T):
        inp = x_btd[:, t].astype(jnp.float32)
        pre = (jnp.dot(h, w_h0_t, precision=jax.lax.Precision.HIGHEST)
               + b_h0
               + jnp.dot(inp, w_in_t, precision=jax.lax.Precision.HIGHEST))
        z = jax.nn.sigmoid(pre)
        h = (1.0 - z) * h + z * inp
        outs.append(h)
    return jnp.stack(outs, axis=1), h


if __name__ == "__main__":
    B, T, D = 2, 8, 32  # batch, seq, input_size (== hidden_size)
    forget_bias = -1.0

    key = jax.random.PRNGKey(0)
    k_x, k_h, k_win, k_wh0 = jax.random.split(key, 4)

    x = jax.random.normal(k_x, (B, T, D), dtype=jnp.float32)
    h0 = jax.random.normal(k_h, (B, D), dtype=jnp.float32)

    # Deterministic parameter init mimicking nn.Linear uniform(-1/sqrt(D), 1/sqrt(D)).
    bound = 1.0 / jnp.sqrt(jnp.float32(D))
    w_in = jax.random.uniform(k_win, (D, D), jnp.float32, -bound, bound)   # fc_in (no bias)
    w_h0 = jax.random.uniform(k_wh0, (D, D), jnp.float32, -bound, bound)   # fc_h0 weight
    b_h0 = jnp.full((D,), forget_bias, dtype=jnp.float32)                  # fc_h0 bias = -1

    outputs, h_final = rtn_rnn_forward(x, h0, w_in, w_h0, b_h0)
    jax.block_until_ready((outputs, h_final))

    ref_out, ref_h = _reference(x, h0, w_in, w_h0, b_h0)
    assert outputs.shape == (B, T, D) and h_final.shape == (B, D)
    # Recurrent matmul runs in bf16 on the MXU (carry/update stay f32), so
    # compare against the f32 reference with a correspondingly relaxed tol.
    assert jnp.allclose(outputs, ref_out, atol=3e-2, rtol=3e-2), (
        float(jnp.max(jnp.abs(outputs - ref_out))))
    assert jnp.allclose(h_final, ref_h, atol=3e-2, rtol=3e-2), (
        float(jnp.max(jnp.abs(h_final - ref_h))))

    print("KERNEL_OK")
</pallas_src>

<mosaic_0001>
module attributes {stable_mosaic.version = 11 : i64} {
  func.func @_rtn_rnn_kernel(%arg0: i32, %arg1: i32, %arg2: memref<8x8x128xf32, #tpu.memory_space<vmem>>, %arg3: memref<8x8x128xf32, #tpu.memory_space<vmem>>, %arg4: memref<8x128xf32, #tpu.memory_space<vmem>>, %arg5: memref<128x128xbf16, #tpu.memory_space<vmem>>, %arg6: memref<8x8x128xf32, #tpu.memory_space<vmem>>, %arg7: memref<8x128xf32, #tpu.memory_space<vmem>>) attributes {dimension_semantics = [#tpu.dimension_semantics<parallel>, #tpu.dimension_semantics<arbitrary>], iteration_bounds = array<i64: 1, 1>, scalar_prefetch = 0 : i64, scratch_operands = 1 : i64, tpu.core_type = #tpu.core_type<tc>, window_params = [{transform_indices = @transform_0, window_bounds = array<i64: 8, 8, 128>}, {transform_indices = @transform_1, window_bounds = array<i64: 8, 8, 128>}, {transform_indices = @transform_2, window_bounds = array<i64: 8, 128>}, {pipeline_mode = #tpu.pipeline_mode<synchronous>, transform_indices = @transform_3, window_bounds = array<i64: 128, 128>}, {transform_indices = @transform_4, window_bounds = array<i64: 8, 8, 128>}]} {
    %c0_i32 = arith.constant 0 : i32
    %0 = arith.cmpi eq, %arg1, %c0_i32 : i32
    %1 = arith.extui %0 : i1 to i32
    %c0_i32_0 = arith.constant 0 : i32
    %2 = arith.cmpi ne, %1, %c0_i32_0 : i32
    scf.if %2 {
      %c0_94 = arith.constant 0 : index
      %c0_95 = arith.constant 0 : index
      %158 = vector.load %arg4[%c0_94, %c0_95] : memref<8x128xf32, #tpu.memory_space<vmem>>, vector<8x128xf32>
      %c0_96 = arith.constant 0 : index
      %c0_97 = arith.constant 0 : index
      %159 = vector.load %arg7[%c0_96, %c0_97] : memref<8x128xf32, #tpu.memory_space<vmem>>, vector<8x128xf32>
      tpu.vector_store %arg7[%c0_96, %c0_97], %158 {strides = array<i32>} : memref<8x128xf32, #tpu.memory_space<vmem>>, vector<8x128xf32>,
    } else {
    }
    %c0 = arith.constant 0 : index
    %c0_1 = arith.constant 0 : index
    %3 = vector.load %arg5[%c0, %c0_1] : memref<128x128xbf16, #tpu.memory_space<vmem>>, vector<128x128xbf16>
    %c0_2 = arith.constant 0 : index
    %c0_3 = arith.constant 0 : index
    %4 = vector.load %arg7[%c0_2, %c0_3] : memref<8x128xf32, #tpu.memory_space<vmem>>, vector<8x128xf32>
    %c0_4 = arith.constant 0 : index
    %c0_5 = arith.constant 0 : index
    %c0_6 = arith.constant 0 : index
    %5 = vector.load %arg2[%c0_4, %c0_5, %c0_6] : memref<8x8x128xf32, #tpu.memory_space<vmem>>, vector<8x1x128xf32>
    %6 = vector.shape_cast %5 : vector<8x1x128xf32> to vector<8x128xf32>
    %c0_7 = arith.constant 0 : index
    %c0_8 = arith.constant 0 : index
    %c0_9 = arith.constant 0 : index
    %7 = vector.load %arg3[%c0_7, %c0_8, %c0_9] : memref<8x8x128xf32, #tpu.memory_space<vmem>>, vector<8x1x128xf32>
    %8 = vector.shape_cast %7 : vector<8x1x128xf32> to vector<8x128xf32>
    %9 = arith.truncf %4 : vector<8x128xf32> to vector<8x128xbf16>
    %cst = arith.constant dense<0.000000e+00> : vector<8x128xf32>
    %10 = tpu.matmul %9, %3, %cst {dimension_numbers = #tpu.dot_dimension_numbers<[1], [0], [0], [1], [0, 0, 1, 1], [], []>} : vector<8x128xbf16>, vector<128x128xbf16>, vector<8x128xf32> -> vector<8x128xf32>
    %11 = arith.addf %10, %8 : vector<8x128xf32>
    %12 = arith.negf %11 : vector<8x128xf32>
    %13 = math.exp %12 : vector<8x128xf32>
    %cst_10 = arith.constant 1.000000e+00 : f32
    %14 = vector.broadcast %cst_10 : f32 to vector<8x128xf32>
    %15 = arith.addf %14, %13 : vector<8x128xf32>
    %16 = arith.divf %14, %15 : vector<8x128xf32>
    %cst_11 = arith.constant 1.000000e+00 : f32
    %17 = vector.broadcast %cst_11 : f32 to vector<8x128xf32>
    %18 = arith.subf %17, %16 : vector<8x128xf32>
    %19 = arith.mulf %18, %4 : vector<8x128xf32>
    %20 = arith.mulf %16, %6 : vector<8x128xf32>
    %21 = arith.addf %19, %20 : vector<8x128xf32>
    %22 = vector.shape_cast %21 : vector<8x128xf32> to vector<8x1x128xf32>
    %c0_12 = arith.constant 0 : index
    %c0_13 = arith.constant 0 : index
    %c0_14 = arith.constant 0 : index
    %23 = vector.load %arg6[%c0_12, %c0_13, %c0_14] : memref<8x8x128xf32, #tpu.memory_space<vmem>>, vector<8x1x128xf32>
    tpu.vector_store %arg6[%c0_12, %c0_13, %c0_14], %22 {strides = array<i32>} : memref<8x8x128xf32, #tpu.memory_space<vmem>>, vector<8x1x128xf32>,
    %c0_15 = arith.constant 0 : index
    %c1 = arith.constant 1 : index
    %c0_16 = arith.constant 0 : index
    %24 = vector.load %arg2[%c0_15, %c1, %c0_16] : memref<8x8x128xf32, #tpu.memory_space<vmem>>, vector<8x1x128xf32>
    %25 = vector.shape_cast %24 : vector<8x1x128xf32> to vector<8x128xf32>
    %c0_17 = arith.constant 0 : index
    %c1_18 = arith.constant 1 : index
    %c0_19 = arith.constant 0 : index
    %26 = vector.load %arg3[%c0_17, %c1_18, %c0_19] : memref<8x8x128xf32, #tpu.memory_space<vmem>>, vector<8x1x128xf32>
    %27 = vector.shape_cast %26 : vector<8x1x128xf32> to vector<8x128xf32>
    %28 = arith.truncf %21 : vector<8x128xf32> to vector<8x128xbf16>
    %cst_20 = arith.constant dense<0.000000e+00> : vector<8x128xf32>
    %29 = tpu.matmul %28, %3, %cst_20 {dimension_numbers = #tpu.dot_dimension_numbers<[1], [0], [0], [1], [0, 0, 1, 1], [], []>} : vector<8x128xbf16>, vector<128x128xbf16>, vector<8x128xf32> -> vector<8x128xf32>
    %30 = arith.addf %29, %27 : vector<8x128xf32>
    %31 = arith.negf %30 : vector<8x128xf32>
    %32 = math.exp %31 : vector<8x128xf32>
    %cst_21 = arith.constant 1.000000e+00 : f32
    %33 = vector.broadcast %cst_21 : f32 to vector<8x128xf32>
    %34 = arith.addf %33, %32 : vector<8x128xf32>
    %35 = arith.divf %33, %34 : vector<8x128xf32>
    %cst_22 = arith.constant 1.000000e+00 : f32
    %36 = vector.broadcast %cst_22 : f32 to vector<8x128xf32>
    %37 = arith.subf %36, %35 : vector<8x128xf32>
    %38 = arith.mulf %37, %21 : vector<8x128xf32>
    %39 = arith.mulf %35, %25 : vector<8x128xf32>
    %40 = arith.addf %38, %39 : vector<8x128xf32>
    %41 = vector.shape_cast %40 : vector<8x128xf32> to vector<8x1x128xf32>
    %c0_23 = arith.constant 0 : index
    %c1_24 = arith.constant 1 : index
    %c0_25 = arith.constant 0 : index
    %42 = vector.load %arg6[%c0_23, %c1_24, %c0_25] : memref<8x8x128xf32, #tpu.memory_space<vmem>>, vector<8x1x128xf32>
    tpu.vector_store %arg6[%c0_23, %c1_24, %c0_25], %41 {strides = array<i32>} : memref<8x8x128xf32, #tpu.memory_space<vmem>>, vector<8x1x128xf32>,
    %c0_26 = arith.constant 0 : index
    %c2 = arith.constant 2 : index
    %c0_27 = arith.constant 0 : index
    %43 = vector.load %arg2[%c0_26, %c2, %c0_27] : memref<8x8x128xf32, #tpu.memory_space<vmem>>, vector<8x1x128xf32>
    %44 = vector.shape_cast %43 : vector<8x1x128xf32> to vector<8x128xf32>
    %c0_28 = arith.constant 0 : index
    %c2_29 = arith.constant 2 : index
    %c0_30 = arith.constant 0 : index
    %45 = vector.load %arg3[%c0_28, %c2_29, %c0_30] : memref<8x8x128xf32, #tpu.memory_space<vmem>>, vector<8x1x128xf32>
    %46 = vector.shape_cast %45 : vector<8x1x128xf32> to vector<8x128xf32>
    %47 = arith.truncf %40 : vector<8x128xf32> to vector<8x128xbf16>
    %cst_31 = arith.constant dense<0.000000e+00> : vector<8x128xf32>
    %48 = tpu.matmul %47, %3, %cst_31 {dimension_numbers = #tpu.dot_dimension_numbers<[1], [0], [0], [1], [0, 0, 1, 1], [], []>} : vector<8x128xbf16>, vector<128x128xbf16>, vector<8x128xf32> -> vector<8x128xf32>
    %49 = arith.addf %48, %46 : vector<8x128xf32>
    %50 = arith.negf %49 : vector<8x128xf32>
    %51 = math.exp %50 : vector<8x128xf32>
    %cst_32 = arith.constant 1.000000e+00 : f32
    %52 = vector.broadcast %cst_32 : f32 to vector<8x128xf32>
    %53 = arith.addf %52, %51 : vector<8x128xf32>
    %54 = arith.divf %52, %53 : vector<8x128xf32>
    %cst_33 = arith.constant 1.000000e+00 : f32
    %55 = vector.broadcast %cst_33 : f32 to vector<8x128xf32>
    %56 = arith.subf %55, %54 : vector<8x128xf32>
    %57 = arith.mulf %56, %40 : vector<8x128xf32>
    %58 = arith.mulf %54, %44 : vector<8x128xf32>
    %59 = arith.addf %57, %58 : vector<8x128xf32>
    %60 = vector.shape_cast %59 : vector<8x128xf32> to vector<8x1x128xf32>
    %c0_34 = arith.constant 0 : index
    %c2_35 = arith.constant 2 : index
    %c0_36 = arith.constant 0 : index
    %61 = vector.load %arg6[%c0_34, %c2_35, %c0_36] : memref<8x8x128xf32, #tpu.memory_space<vmem>>, vector<8x1x128xf32>
    tpu.vector_store %arg6[%c0_34, %c2_35, %c0_36], %60 {strides = array<i32>} : memref<8x8x128xf32, #tpu.memory_space<vmem>>, vector<8x1x128xf32>,
    %c0_37 = arith.constant 0 : index
    %c3 = arith.constant 3 : index
    %c0_38 = arith.constant 0 : index
    %62 = vector.load %arg2[%c0_37, %c3, %c0_38] : memref<8x8x128xf32, #tpu.memory_space<vmem>>, vector<8x1x128xf32>
    %63 = vector.shape_cast %62 : vector<8x1x128xf32> to vector<8x128xf32>
    %c0_39 = arith.constant 0 : index
    %c3_40 = arith.constant 3 : index
    %c0_41 = arith.constant 0 : index
    %64 = vector.load %arg3[%c0_39, %c3_40, %c0_41] : memref<8x8x128xf32, #tpu.memory_space<vmem>>, vector<8x1x128xf32>
    %65 = vector.shape_cast %64 : vector<8x1x128xf32> to vector<8x128xf32>
    %66 = arith.truncf %59 : vector<8x128xf32> to vector<8x128xbf16>
    %cst_42 = arith.constant dense<0.000000e+00> : vector<8x128xf32>
    %67 = tpu.matmul %66, %3, %cst_42 {dimension_numbers = #tpu.dot_dimension_numbers<[1], [0], [0], [1], [0, 0, 1, 1], [], []>} : vector<8x128xbf16>, vector<128x128xbf16>, vector<8x128xf32> -> vector<8x128xf32>
    %68 = arith.addf %67, %65 : vector<8x128xf32>
    %69 = arith.negf %68 : vector<8x128xf32>
    %70 = math.exp %69 : vector<8x128xf32>
    %cst_43 = arith.constant 1.000000e+00 : f32
    %71 = vector.broadcast %cst_43 : f32 to vector<8x128xf32>
    %72 = arith.addf %71, %70 : vector<8x128xf32>
    %73 = arith.divf %71, %72 : vector<8x128xf32>
    %cst_44 = arith.constant 1.000000e+00 : f32
    %74 = vector.broadcast %cst_44 : f32 to vector<8x128xf32>
    %75 = arith.subf %74, %73 : vector<8x128xf32>
    %76 = arith.mulf %75, %59 : vector<8x128xf32>
    %77 = arith.mulf %73, %63 : vector<8x128xf32>
    %78 = arith.addf %76, %77 : vector<8x128xf32>
    %79 = vector.shape_cast %78 : vector<8x128xf32> to vector<8x1x128xf32>
    %c0_45 = arith.constant 0 : index
    %c3_46 = arith.constant 3 : index
    %c0_47 = arith.constant 0 : index
    %80 = vector.load %arg6[%c0_45, %c3_46, %c0_47] : memref<8x8x128xf32, #tpu.memory_space<vmem>>, vector<8x1x128xf32>
    tpu.vector_store %arg6[%c0_45, %c3_46, %c0_47], %79 {strides = array<i32>} : memref<8x8x128xf32, #tpu.memory_space<vmem>>, vector<8x1x128xf32>,
    %c0_48 = arith.constant 0 : index
    %c4 = arith.constant 4 : index
    %c0_49 = arith.constant 0 : index
    %81 = vector.load %arg2[%c0_48, %c4, %c0_49] : memref<8x8x128xf32, #tpu.memory_space<vmem>>, vector<8x1x128xf32>
    %82 = vector.shape_cast %81 : vector<8x1x128xf32> to vector<8x128xf32>
    %c0_50 = arith.constant 0 : index
    %c4_51 = arith.constant 4 : index
    %c0_52 = arith.constant 0 : index
    %83 = vector.load %arg3[%c0_50, %c4_51, %c0_52] : memref<8x8x128xf32, #tpu.memory_space<vmem>>, vector<8x1x128xf32>
    %84 = vector.shape_cast %83 : vector<8x1x128xf32> to vector<8x128xf32>
    %85 = arith.truncf %78 : vector<8x128xf32> to vector<8x128xbf16>
    %cst_53 = arith.constant dense<0.000000e+00> : vector<8x128xf32>
    %86 = tpu.matmul %85, %3, %cst_53 {dimension_numbers = #tpu.dot_dimension_numbers<[1], [0], [0], [1], [0, 0, 1, 1], [], []>} : vector<8x128xbf16>, vector<128x128xbf16>, vector<8x128xf32> -> vector<8x128xf32>
    %87 = arith.addf %86, %84 : vector<8x128xf32>
    %88 = arith.negf %87 : vector<8x128xf32>
    %89 = math.exp %88 : vector<8x128xf32>
    %cst_54 = arith.constant 1.000000e+00 : f32
    %90 = vector.broadcast %cst_54 : f32 to vector<8x128xf32>
    %91 = arith.addf %90, %89 : vector<8x128xf32>
    %92 = arith.divf %90, %91 : vector<8x128xf32>
    %cst_55 = arith.constant 1.000000e+00 : f32
    %93 = vector.broadcast %cst_55 : f32 to vector<8x128xf32>
    %94 = arith.subf %93, %92 : vector<8x128xf32>
    %95 = arith.mulf %94, %78 : vector<8x128xf32>
    %96 = arith.mulf %92, %82 : vector<8x128xf32>
    %97 = arith.addf %95, %96 : vector<8x128xf32>
    %98 = vector.shape_cast %97 : vector<8x128xf32> to vector<8x1x128xf32>
    %c0_56 = arith.constant 0 : index
    %c4_57 = arith.constant 4 : index
    %c0_58 = arith.constant 0 : index
    %99 = vector.load %arg6[%c0_56, %c4_57, %c0_58] : memref<8x8x128xf32, #tpu.memory_space<vmem>>, vector<8x1x128xf32>
    tpu.vector_store %arg6[%c0_56, %c4_57, %c0_58], %98 {strides = array<i32>} : memref<8x8x128xf32, #tpu.memory_space<vmem>>, vector<8x1x128xf32>,
    %c0_59 = arith.constant 0 : index
    %c5 = arith.constant 5 : index
    %c0_60 = arith.constant 0 : index
    %100 = vector.load %arg2[%c0_59, %c5, %c0_60] : memref<8x8x128xf32, #tpu.memory_space<vmem>>, vector<8x1x128xf32>
    %101 = vector.shape_cast %100 : vector<8x1x128xf32> to vector<8x128xf32>
    %c0_61 = arith.constant 0 : index
    %c5_62 = arith.constant 5 : index
    %c0_63 = arith.constant 0 : index
    %102 = vector.load %arg3[%c0_61, %c5_62, %c0_63] : memref<8x8x128xf32, #tpu.memory_space<vmem>>, vector<8x1x128xf32>
    %103 = vector.shape_cast %102 : vector<8x1x128xf32> to vector<8x128xf32>
    %104 = arith.truncf %97 : vector<8x128xf32> to vector<8x128xbf16>
    %cst_64 = arith.constant dense<0.000000e+00> : vector<8x128xf32>
    %105 = tpu.matmul %104, %3, %cst_64 {dimension_numbers = #tpu.dot_dimension_numbers<[1], [0], [0], [1], [0, 0, 1, 1], [], []>} : vector<8x128xbf16>, vector<128x128xbf16>, vector<8x128xf32> -> vector<8x128xf32>
    %106 = arith.addf %105, %103 : vector<8x128xf32>
    %107 = arith.negf %106 : vector<8x128xf32>
    %108 = math.exp %107 : vector<8x128xf32>
    %cst_65 = arith.constant 1.000000e+00 : f32
    %109 = vector.broadcast %cst_65 : f32 to vector<8x128xf32>
    %110 = arith.addf %109, %108 : vector<8x128xf32>
    %111 = arith.divf %109, %110 : vector<8x128xf32>
    %cst_66 = arith.constant 1.000000e+00 : f32
    %112 = vector.broadcast %cst_66 : f32 to vector<8x128xf32>
    %113 = arith.subf %112, %111 : vector<8x128xf32>
    %114 = arith.mulf %113, %97 : vector<8x128xf32>
    %115 = arith.mulf %111, %101 : vector<8x128xf32>
    %116 = arith.addf %114, %115 : vector<8x128xf32>
    %117 = vector.shape_cast %116 : vector<8x128xf32> to vector<8x1x128xf32>
    %c0_67 = arith.constant 0 : index
    %c5_68 = arith.constant 5 : index
    %c0_69 = arith.constant 0 : index
    %118 = vector.load %arg6[%c0_67, %c5_68, %c0_69] : memref<8x8x128xf32, #tpu.memory_space<vmem>>, vector<8x1x128xf32>
    tpu.vector_store %arg6[%c0_67, %c5_68, %c0_69], %117 {strides = array<i32>} : memref<8x8x128xf32, #tpu.memory_space<vmem>>, vector<8x1x128xf32>,
    %c0_70 = arith.constant 0 : index
    %c6 = arith.constant 6 : index
    %c0_71 = arith.constant 0 : index
    %119 = vector.load %arg2[%c0_70, %c6, %c0_71] : memref<8x8x128xf32, #tpu.memory_space<vmem>>, vector<8x1x128xf32>
    %120 = vector.shape_cast %119 : vector<8x1x128xf32> to vector<8x128xf32>
    %c0_72 = arith.constant 0 : index
    %c6_73 = arith.constant 6 : index
    %c0_74 = arith.constant 0 : index
    %121 = vector.load %arg3[%c0_72, %c6_73, %c0_74] : memref<8x8x128xf32, #tpu.memory_space<vmem>>, vector<8x1x128xf32>
    %122 = vector.shape_cast %121 : vector<8x1x128xf32> to vector<8x128xf32>
    %123 = arith.truncf %116 : vector<8x128xf32> to vector<8x128xbf16>
    %cst_75 = arith.constant dense<0.000000e+00> : vector<8x128xf32>
    %124 = tpu.matmul %123, %3, %cst_75 {dimension_numbers = #tpu.dot_dimension_numbers<[1], [0], [0], [1], [0, 0, 1, 1], [], []>} : vector<8x128xbf16>, vector<128x128xbf16>, vector<8x128xf32> -> vector<8x128xf32>
    %125 = arith.addf %124, %122 : vector<8x128xf32>
    %126 = arith.negf %125 : vector<8x128xf32>
    %127 = math.exp %126 : vector<8x128xf32>
    %cst_76 = arith.constant 1.000000e+00 : f32
    %128 = vector.broadcast %cst_76 : f32 to vector<8x128xf32>
    %129 = arith.addf %128, %127 : vector<8x128xf32>
    %130 = arith.divf %128, %129 : vector<8x128xf32>
    %cst_77 = arith.constant 1.000000e+00 : f32
    %131 = vector.broadcast %cst_77 : f32 to vector<8x128xf32>
    %132 = arith.subf %131, %130 : vector<8x128xf32>
    %133 = arith.mulf %132, %116 : vector<8x128xf32>
    %134 = arith.mulf %130, %120 : vector<8x128xf32>
    %135 = arith.addf %133, %134 : vector<8x128xf32>
    %136 = vector.shape_cast %135 : vector<8x128xf32> to vector<8x1x128xf32>
    %c0_78 = arith.constant 0 : index
    %c6_79 = arith.constant 6 : index
    %c0_80 = arith.constant 0 : index
    %137 = vector.load %arg6[%c0_78, %c6_79, %c0_80] : memref<8x8x128xf32, #tpu.memory_space<vmem>>, vector<8x1x128xf32>
    tpu.vector_store %arg6[%c0_78, %c6_79, %c0_80], %136 {strides = array<i32>} : memref<8x8x128xf32, #tpu.memory_space<vmem>>, vector<8x1x128xf32>,
    %c0_81 = arith.constant 0 : index
    %c7 = arith.constant 7 : index
    %c0_82 = arith.constant 0 : index
    %138 = vector.load %arg2[%c0_81, %c7, %c0_82] : memref<8x8x128xf32, #tpu.memory_space<vmem>>, vector<8x1x128xf32>
    %139 = vector.shape_cast %138 : vector<8x1x128xf32> to vector<8x128xf32>
    %c0_83 = arith.constant 0 : index
    %c7_84 = arith.constant 7 : index
    %c0_85 = arith.constant 0 : index
    %140 = vector.load %arg3[%c0_83, %c7_84, %c0_85] : memref<8x8x128xf32, #tpu.memory_space<vmem>>, vector<8x1x128xf32>
    %141 = vector.shape_cast %140 : vector<8x1x128xf32> to vector<8x128xf32>
    %142 = arith.truncf %135 : vector<8x128xf32> to vector<8x128xbf16>
    %cst_86 = arith.constant dense<0.000000e+00> : vector<8x128xf32>
    %143 = tpu.matmul %142, %3, %cst_86 {dimension_numbers = #tpu.dot_dimension_numbers<[1], [0], [0], [1], [0, 0, 1, 1], [], []>} : vector<8x128xbf16>, vector<128x128xbf16>, vector<8x128xf32> -> vector<8x128xf32>
    %144 = arith.addf %143, %141 : vector<8x128xf32>
    %145 = arith.negf %144 : vector<8x128xf32>
    %146 = math.exp %145 : vector<8x128xf32>
    %cst_87 = arith.constant 1.000000e+00 : f32
    %147 = vector.broadcast %cst_87 : f32 to vector<8x128xf32>
    %148 = arith.addf %147, %146 : vector<8x128xf32>
    %149 = arith.divf %147, %148 : vector<8x128xf32>
    %cst_88 = arith.constant 1.000000e+00 : f32
    %150 = vector.broadcast %cst_88 : f32 to vector<8x128xf32>
    %151 = arith.subf %150, %149 : vector<8x128xf32>
    %152 = arith.mulf %151, %135 : vector<8x128xf32>
    %153 = arith.mulf %149, %139 : vector<8x128xf32>
    %154 = arith.addf %152, %153 : vector<8x128xf32>
    %155 = vector.shape_cast %154 : vector<8x128xf32> to vector<8x1x128xf32>
    %c0_89 = arith.constant 0 : index
    %c7_90 = arith.constant 7 : index
    %c0_91 = arith.constant 0 : index
    %156 = vector.load %arg6[%c0_89, %c7_90, %c0_91] : memref<8x8x128xf32, #tpu.memory_space<vmem>>, vector<8x1x128xf32>
    tpu.vector_store %arg6[%c0_89, %c7_90, %c0_91], %155 {strides = array<i32>} : memref<8x8x128xf32, #tpu.memory_space<vmem>>, vector<8x1x128xf32>,
    %c0_92 = arith.constant 0 : index
    %c0_93 = arith.constant 0 : index
    %157 = vector.load %arg7[%c0_92, %c0_93] : memref<8x128xf32, #tpu.memory_space<vmem>>, vector<8x128xf32>
    tpu.vector_store %arg7[%c0_92, %c0_93], %154 {strides = array<i32>} : memref<8x128xf32, #tpu.memory_space<vmem>>, vector<8x128xf32>,
    return
  }
  func.func @transform_0(%arg0: i32, %arg1: i32) -> (i32, i32, i32) {
    %c0_i32 = arith.constant 0 : i32
    %c0_i32_0 = arith.constant 0 : i32
    return %arg0, %arg1, %c0_i32 : i32, i32, i32
  }
  func.func @transform_1(%arg0: i32, %arg1: i32) -> (i32, i32, i32) {
    %c0_i32 = arith.constant 0 : i32
    %c0_i32_0 = arith.constant 0 : i32
    return %arg0, %arg1, %c0_i32 : i32, i32, i32
  }
  func.func @transform_2(%arg0: i32, %arg1: i32) -> (i32, i32) {
    %c0_i32 = arith.constant 0 : i32
    %c0_i32_0 = arith.constant 0 : i32
    return %arg0, %c0_i32 : i32, i32
  }
  func.func @transform_3(%arg0: i32, %arg1: i32) -> (i32, i32) {
    %c0_i32 = arith.constant 0 : i32
    %c0_i32_0 = arith.constant 0 : i32
    %c0_i32_1 = arith.constant 0 : i32
    return %c0_i32, %c0_i32_0 : i32, i32
  }
  func.func @transform_4(%arg0: i32, %arg1: i32) -> (i32, i32, i32) {
    %c0_i32 = arith.constant 0 : i32
    %c0_i32_0 = arith.constant 0 : i32
    return %arg0, %arg1, %c0_i32 : i32, i32, i32
  }
}

</mosaic_0001>

<bundles_post_ra>
// kernel: rtn_rnn_forward.1
= control target key start
LH: loop header
LB: loop body
LE: loop exit
PB: predicated region body
PF: predicated region fallthrough
CT: control target
= control target key end

     0   :  { %v1864_v0 = vmov 0.0   ;;  %vm1865_vm0 = vmmov 0   ;;  %vm115_vm1 = vcmask 1041409   ;;  %vm118_vm2 = vcmask 1042434   ;;  %s2894_s3 = inlined_call_operand.vmem [shape: bf16[128,128], index: 3, kind: input, shape index: {}]   ;;  %s2895_s2 = inlined_call_operand.vmem [shape: f32[8,128], index: 2, kind: input, shape index: {}]   ;;  %s2896_s1 = inlined_call_operand.vmem [shape: f32[8,8,128], index: 1, kind: input, shape index: {}]   ;;  %s2897_s0 = inlined_call_operand.vmem [shape: f32[8,8,128], index: 0, kind: input, shape index: {}]   ;;  %s2898_s4 = inlined_call_operand.vmem [shape: f32[8,8,128], index: 4, kind: output, shape index: {}]  }
   0x1   :  { %1653 = vmatprep.subr.bf16.mxu0 %v1864_v0  ;;  %v1896_v1 = vld [vmem:[%s2894_s3] sm:$0xff]   ;;  %1669 = vmatprep.mubr.msk.bf16.mxu0 %vm1865_vm0, %v1864_v0  ;;  %v1907_v2 = vld [vmem:[%s2894_s3 + $0x8] sm:$0xff]   ;;  %v1916_v3 = vld [vmem:[%s2894_s3 + $0x10] sm:$0xff]   ;;  %vm121_vm3 = vcmask 1043459   ;;  %vm124_vm4 = vcmask 1044484   ;;  %vm127_vm5 = vcmask 1045509   ;;  %v214_v62 = vlaneseq }
   0x2   :  { %1673 = vmatprep.subr.bf16.mxu1 %v1864_v0  ;;  %1689 = vmatprep.mubr.msk.bf16.mxu1 %vm1865_vm0, %v1864_v0  ;;  %v1925_v4 = vld [vmem:[%s2894_s3 + $0x18] sm:$0xff]   ;;  %v1934_v5 = vld [vmem:[%s2894_s3 + $0x20] sm:$0xff]   ;;  %v1943_v6 = vld [vmem:[%s2894_s3 + $0x28] sm:$0xff]   ;;  %vm130_vm6 = vcmask 1046534   ;;  %vm133_vm7 = vcmask 1047559  }
   0x3   :  { %1654 = vmatpush3.bf16.msra.mxu0 %v1896_v1  ;;  %1674 = vmatpush3.bf16.msra.mxu1 %v1896_v1  ;;  %v1952_v7 = vld [vmem:[%s2894_s3 + $0x30] sm:$0xff]   ;;  %v1961_v8 = vld [vmem:[%s2894_s3 + $0x38] sm:$0xff]   ;;  %v1966_v9 = vld [vmem:[%s2895_s2] sm:$0xff]  ;;  %v1866_v60 = vmov 1966171168  }
   0x4   :  { %1655 = vmatprep.subr.bf16.mxu0 %v1864_v0  ;;  %1675 = vmatprep.subr.bf16.mxu1 %v1864_v0  ;;  %v57_v10 = vpack.c.bf16 %v1966_v9, %v1966_v9  ;;  %v50_v11 = vld [vmem:[%s2896_s1 + $0x8] sm:$0x1]  ;;  %v51_v12 = vld [vmem:[%s2896_s1 + $0x10] sm:$0x1]  ;;  %v49_v14 = vld [vmem:[%s2896_s1] sm:$0x1]  ;;  %v212_v61 = vunpack.c.l.s4 %v1866_v60 }
   0x5   :  { %v114_v13 = vrot.slane %v50_v11, 7  ;;  %v52_v15 = vld [vmem:[%s2896_s1 + $0x18] sm:$0x1]  ;;  %v117_v16 = vrot.slane %v51_v12, 6  ;;  %v53_v18 = vld [vmem:[%s2896_s1 + $0x20] sm:$0x1] }
   0x6   :  { %v120_v19 = vrot.slane %v52_v15, 5  ;;  %v54_v21 = vld [vmem:[%s2896_s1 + $0x28] sm:$0x1]  ;;  %v123_v22 = vrot.slane %v53_v18, 4  ;;  %v55_v24 = vld [vmem:[%s2896_s1 + $0x30] sm:$0x1]  ;;  %v213_v11 = vunpack.c.0.s8 %v212_v61 }
   0x7   :  { %1656 = vmatpush3.bf16.msra.mxu0 %v1907_v2  ;;  %1676 = vmatpush3.bf16.msra.mxu1 %v1907_v2  ;;  %v116_v17 = vsel %vm115_vm1, %v114_v13, %v49_v14  ;;  %v126_v25 = vrot.slane %v54_v21, 3  ;;  %v56_v27 = vld [vmem:[%s2896_s1 + $0x38] sm:$0x1]  ;;  %v129_v28 = vrot.slane %v55_v24, 2  ;;  %v42_v39 = vld [vmem:[%s2897_s0 + $0x8] sm:$0x1] }
   0x8   :  { %1657 = vmatprep.subr.bf16.mxu0 %v1864_v0  ;;  %1677 = vmatprep.subr.bf16.mxu1 %v1864_v0  ;;  %v119_v20 = vsel %vm118_vm2, %v117_v16, %v116_v17  ;;  %v132_v30 = vrot.slane %v56_v27, 1  ;;  %v43_v40 = vld [vmem:[%s2897_s0 + $0x10] sm:$0x1]  ;;  %v192_v41 = vrot.slane %v42_v39, 7  ;;  %v41_v42 = vld [vmem:[%s2897_s0] sm:$0x1] }
   0x9   :  { %v122_v23 = vsel %vm121_vm3, %v120_v19, %v119_v20  ;;  %v44_v43 = vld [vmem:[%s2897_s0 + $0x18] sm:$0x1]  ;;  %v194_v44 = vrot.slane %v43_v40, 6  ;;  %v45_v46 = vld [vmem:[%s2897_s0 + $0x20] sm:$0x1]  ;;  %v215_v12 = vshrl.u32 %v214_v62, 7 }
   0xa   :  { %v125_v26 = vsel %vm124_vm4, %v123_v22, %v122_v23  ;;  %v193_v45 = vsel %vm115_vm1, %v192_v41, %v41_v42  ;;  %v196_v47 = vrot.slane %v44_v43, 5  ;;  %v46_v50 = vld [vmem:[%s2897_s0 + $0x28] sm:$0x1]  ;;  %v198_v51 = vrot.slane %v45_v46, 4  ;;  %v47_v54 = vld [vmem:[%s2897_s0 + $0x30] sm:$0x1] }
   0xb   :  { %1658 = vmatpush3.bf16.msra.mxu0 %v1916_v3  ;;  %1678 = vmatpush3.bf16.msra.mxu1 %v1916_v3  ;;  %v128_v29 = vsel %vm127_vm5, %v126_v25, %v125_v26  ;;  %v195_v48 = vsel %vm118_vm2, %v194_v44, %v193_v45  ;;  %v200_v55 = vrot.slane %v46_v50, 3  ;;  %v48_v57 = vld [vmem:[%s2897_s0 + $0x38] sm:$0x1]  ;;  %v202_v58 = vrot.slane %v47_v54, 2  ;;  %v287_v40 = vld [vmem:[%s2896_s1 + $0x21] sm:$0x1] }
   0xc   :  { %1659 = vmatprep.subr.bf16.mxu0 %v1864_v0  ;;  %1679 = vmatprep.subr.bf16.mxu1 %v1864_v0  ;;  %v131_v31 = vsel %vm130_vm6, %v129_v28, %v128_v29  ;;  %v197_v53 = vsel %vm121_vm3, %v196_v47, %v195_v48  ;;  %v204_v63 = vrot.slane %v48_v57, 1  ;;  %v2058_v18 = vsub.s32 %v213_v11, %v215_v12  ;;  %v288_v43 = vld [vmem:[%s2896_s1 + $0x29] sm:$0x1]  ;;  %v289_v46 = vld [vmem:[%s2896_s1 + $0x31] sm:$0x1] }
   0xd   :  { %v134_v32 = vsel %vm133_vm7, %v132_v30, %v131_v31  ;;  %v199_v56 = vsel %vm124_vm4, %v198_v51, %v197_v53  ;;  %v306_v44 = vrot.slane %v287_v40, 4  ;;  %v308_v47 = vrot.slane %v288_v43, 3  ;;  %v277_v62 = vld [vmem:[%s2897_s0 + $0x11] sm:$0x1]  ;;  %v278_v11 = vld [vmem:[%s2897_s0 + $0x19] sm:$0x1] }
   0xe   :  { %v201_v59 = vsel %vm127_vm5, %v200_v55, %v199_v56  ;;  %v310_v50 = vrot.slane %v289_v46, 2  ;;  %v373_v12 = vrot.slane %v277_v62, 6 }
   0xf   :  { %1660 = vmatpush3.bf16.msra.mxu0 %v1925_v4  ;;  %1680 = vmatpush3.bf16.msra.mxu1 %v1925_v4 }
  0x10   :  { %1661 = vmatprep.subr.bf16.mxu0 %v1864_v0  ;;  %1681 = vmatprep.subr.bf16.mxu1 %v1864_v0 }
  0x13   :  { %1662 = vmatpush3.bf16.msra.mxu0 %v1934_v5  ;;  %1682 = vmatpush3.bf16.msra.mxu1 %v1934_v5 }
  0x14   :  { %1663 = vmatprep.subr.bf16.mxu0 %v1864_v0  ;;  %1683 = vmatprep.subr.bf16.mxu1 %v1864_v0 }
  0x17   :  { %1664 = vmatpush3.bf16.msra.mxu0 %v1943_v6  ;;  %1684 = vmatpush3.bf16.msra.mxu1 %v1943_v6 }
  0x18   :  { %1665 = vmatprep.subr.bf16.mxu0 %v1864_v0  ;;  %1685 = vmatprep.subr.bf16.mxu1 %v1864_v0 }
  0x1b   :  { %1666 = vmatpush3.bf16.msra.mxu0 %v1952_v7  ;;  %1686 = vmatpush3.bf16.msra.mxu1 %v1952_v7 }
  0x1c   :  { %1667 = vmatprep.subr.bf16.mxu0 %v1864_v0  ;;  %1687 = vmatprep.subr.bf16.mxu1 %v1864_v0 }
  0x1f   :  { %1668 = vmatpush3.bf16.msra.mxu0 %v1961_v8  ;;  %1688 = vmatpush3.bf16.msra.mxu1 %v1961_v8 }
  0x20   :  { %1693 = vmatprep.subr.bf16.mxu0 %v1864_v0  ;;  %1713 = vmatprep.subr.bf16.mxu1 %v1864_v0 }
  0x22   :  { %1670 = vmatmul.mubr.bf16.vlgmr.msra.gmra.mrb[0].mxu0 %v57_v10  ;;  %v203_v10 = vsel %vm130_vm6, %v202_v58, %v201_v59  ;;  %v276_v59 = vld [vmem:[%s2897_s0 + $0x9] sm:$0x1] }
  0x23   :  { %1694 = vmatpush3.bf16.msra.mxu0 %v1896_v1  ;;  %1709 = vmatprep.mubr.msk.bf16.mxu0 %vm1865_vm0, %v1864_v0  ;;  %v205_v14 = vsel %vm133_vm7, %v204_v63, %v203_v10  ;;  %v371_v63 = vrot.slane %v276_v59, 7  ;;  %v275_v10 = vld [vmem:[%s2897_s0 + $0x1] sm:$0x1] }
  0x24   :  { %1695 = vmatprep.subr.bf16.mxu0 %v1864_v0 }
  0x27   :  { %1696 = vmatpush3.bf16.msra.mxu0 %v1907_v2 }
  0x28   :  { %1697 = vmatprep.subr.bf16.mxu0 %v1864_v0 }
  0x2b   :  { %1698 = vmatpush3.bf16.msra.mxu0 %v1916_v3 }
  0x2c   :  { %1699 = vmatprep.subr.bf16.mxu0 %v1864_v0 }
  0x2f   :  { %1700 = vmatpush3.bf16.msra.mxu0 %v1925_v4 }
  0x30   :  { %1701 = vmatprep.subr.bf16.mxu0 %v1864_v0 }
  0x33   :  { %1702 = vmatpush3.bf16.msra.mxu0 %v1934_v5 }
  0x34   :  { %1703 = vmatprep.subr.bf16.mxu0 %v1864_v0 }
  0x37   :  { %1704 = vmatpush3.bf16.msra.mxu0 %v1943_v6 }
  0x38   :  { %1705 = vmatprep.subr.bf16.mxu0 %v1864_v0 }
  0x3b   :  { %1706 = vmatpush3.bf16.msra.mxu0 %v1952_v7 }
  0x3c   :  { %1707 = vmatprep.subr.bf16.mxu0 %v1864_v0 }
  0x3f   :  { %1708 = vmatpush3.bf16.msra.mxu0 %v1961_v8 }
  0x40   :  { %1733 = vmatprep.subr.bf16.mxu0 %v1864_v0 }
  0xf5   :  { %v170_v33 = vpop.f32.mrb[0].mxu0 }
  0xf6   :  { %v171_v34 = vadd.f32 %v170_v33, %v134_v32  ;;  %v1671_v35 = vpop.f32.mrb[1].mxu0  ;;  %v284_v33 = vld [vmem:[%s2896_s1 + $0x9] sm:$0x1] }
  0xf7   :  { %v173_v36 = vpop.f32.mrb[2].mxu0  ;;  %v300_v35 = vrot.slane %v284_v33, 7 }
  0xf8   :  { %v1541_v37 = vmul.f32 -1.442695, %v171_v34  ;;  %v1672_v38 = vpop.f32.mrb[3].mxu0  ;;  %v285_v34 = vld [vmem:[%s2896_s1 + $0x11] sm:$0x1] }
  0xf9   :  { %v283_v36 = vld [vmem:[%s2896_s1 + $0x1] sm:$0x1]  ;;  %v302_v38 = vrot.slane %v285_v34, 6 }
  0xfa   :  { %1824 = vpow2.f32 %v1541_v37  ;;  %v286_v37 = vld [vmem:[%s2896_s1 + $0x19] sm:$0x1]  ;;  %v301_v39 = vsel %vm115_vm1, %v300_v35, %v283_v36 }
  0xfb   :  { %v304_v41 = vrot.slane %v286_v37, 5  ;;  %v303_v42 = vsel %vm118_vm2, %v302_v38, %v301_v39 }
  0xfd   :  { %v305_v45 = vsel %vm121_vm3, %v304_v41, %v303_v42 }
  0xfe   :  { %v307_v48 = vsel %vm124_vm4, %v306_v44, %v305_v45 }
  0xff   :  { %v309_v51 = vsel %vm127_vm5, %v308_v47, %v307_v48 }
 0x100   :  { %v311_v53 = vsel %vm130_vm6, %v310_v50, %v309_v51  ;;  %v463_v50 = vld [vmem:[%s2896_s1 + $0xa] sm:$0x1]  ;;  %v464_v51 = vld [vmem:[%s2896_s1 + $0x12] sm:$0x1] }
 0x104   :  { %v1825_v49 = vpop.eup %1824 }
 0x105   :  { %v179_v52 = vadd.f32 1.0, %v1825_v49  ;;  %v290_v49 = vld [vmem:[%s2896_s1 + $0x39] sm:$0x1] }
 0x107   :  { %1826 = vrcp.f32 %v179_v52  ;;  %v312_v52 = vrot.slane %v290_v49, 1 }
 0x109   :  { %v313_v54 = vsel %vm133_vm7, %v312_v52, %v311_v53  ;;  %v479_v52 = vrot.slane %v463_v50, 7  ;;  %v462_v53 = vld [vmem:[%s2896_s1 + $0x2] sm:$0x1] }
 0x111   :  { %v1827_v13 = vpop.eup %1826 }
 0x112   :  { %v182_v15 = vsub.f32 1.0, %v1827_v13  ;;  %v207_v17 = vmul.f32 %v1827_v13, %v205_v14  ;;  %v372_v13 = vsel %vm115_vm1, %v371_v63, %v275_v10  ;;  %v279_v14 = vld [vmem:[%s2897_s0 + $0x21] sm:$0x1]  ;;  %v468_v63 = vld [vmem:[%s2896_s1 + $0x32] sm:$0x1] }
 0x114   :  { %v183_v16 = vmul.f32 %v182_v15, %v1966_v9  ;;  %v375_v15 = vrot.slane %v278_v11, 5 }
 0x116   :  { %v2060_v19 = vadd.f32 %v207_v17, %v183_v16  ;;  %v374_v16 = vsel %vm118_vm2, %v373_v12, %v372_v13  ;;  %v469_v12 = vld [vmem:[%s2896_s1 + $0x3a] sm:$0x1]  ;;  %v489_v13 = vrot.slane %v468_v63, 2 }
 0x118   :  { %v210_v20 = vcombine.high %v2060_v19, %v2060_v19  ;;  %v217_v21 = vrot.slane %v2060_v19, %v2058_v18  ;;  %v291_v22 = vpack.c.bf16 %v2060_v19, %v2060_v19 }
 0x11a   :  { %v224_v23 = vrot.slane %v210_v20, %v2058_v18  ;;  %v225_v24 = vcombine.high %v217_v21, %v217_v21  ;;  %v233_v25 = vrot.slane %v217_v21, %v2058_v18  ;;  %1542 = vst.sshfl [vmem:[%s2898_s4] sm:$0x1 pattern:$0x73625140] %v217_v21  ;;  %1690 = vmatmul.mubr.bf16.vlgmr.msra.gmra.mrb[0].mxu1 %v291_v22  ;;  %v280_v20 = vld [vmem:[%s2897_s0 + $0x29] sm:$0x1]  ;;  %v377_v21 = vrot.slane %v279_v14, 4 }
 0x11b   :  { %1714 = vmatpush3.bf16.msra.mxu1 %v1896_v1  ;;  %1729 = vmatprep.mubr.msk.bf16.mxu1 %vm1865_vm0, %v1864_v0 }
 0x11c   :  { %v226_v9 = vcombine.high %v224_v23, %v224_v23  ;;  %v240_v26 = vrot.slane %v224_v23, %v2058_v18  ;;  %v247_v27 = vrot.slane %v225_v24, %v2058_v18  ;;  %v255_v28 = vcombine.high %v233_v25, %v233_v25  ;;  %1543 = vst.sshfl [vmem:[%s2898_s4 + $0x8] sm:$0x1 pattern:$0x73625140] %v225_v24  ;;  %v281_v24 = vld [vmem:[%s2897_s0 + $0x31] sm:$0x1] }
 0x11d   :  { %1544 = vst.sshfl [vmem:[%s2898_s4 + $0x20] sm:$0x1 pattern:$0x73625140] %v224_v23  ;;  %1715 = vmatprep.subr.bf16.mxu1 %v1864_v0  ;;  %v376_v23 = vsel %vm121_vm3, %v375_v15, %v374_v16  ;;  %v379_v25 = vrot.slane %v280_v20, 3  ;;  %v491_v15 = vrot.slane %v469_v12, 1 }
 0x11e   :  { %v254_v29 = vrot.slane %v226_v9, %v2058_v18  ;;  %v256_v30 = vcombine.high %v240_v26, %v240_v26  ;;  %v257_v31 = vcombine.high %v247_v27, %v247_v27  ;;  %269 = vst [vmem:[%s2898_s4 + $0x10] sm:$0x1] %v255_v28  ;;  %1545 = vst.sshfl [vmem:[%s2898_s4 + $0x28] sm:$0x1 pattern:$0x73625140] %v226_v9 }
 0x11f   :  { %1716 = vmatpush3.bf16.msra.mxu1 %v1907_v2  ;;  %v378_v9 = vsel %vm124_vm4, %v377_v21, %v376_v23  ;;  %v282_v26 = vld [vmem:[%s2897_s0 + $0x39] sm:$0x1]  ;;  %v381_v27 = vrot.slane %v281_v24, 2  ;;  %v455_v24 = vld [vmem:[%s2897_s0 + $0xa] sm:$0x1] }
 0x120   :  { %v258_v32 = vcombine.high %v254_v29, %v254_v29  ;;  %270 = vst [vmem:[%s2898_s4 + $0x18] sm:$0x1] %v257_v31  ;;  %273 = vst [vmem:[%s2898_s4 + $0x30] sm:$0x1] %v256_v30  ;;  %1717 = vmatprep.subr.bf16.mxu1 %v1864_v0  ;;  %v380_v28 = vsel %vm127_vm5, %v379_v25, %v378_v9  ;;  %v383_v29 = vrot.slane %v282_v26, 1 }
 0x121   :  { %v382_v30 = vsel %vm130_vm6, %v381_v27, %v380_v28  ;;  %v456_v26 = vld [vmem:[%s2897_s0 + $0x12] sm:$0x1]  ;;  %v550_v27 = vrot.slane %v455_v24, 7  ;;  %v454_v28 = vld [vmem:[%s2897_s0 + $0x2] sm:$0x1] }
 0x122   :  { %274 = vst [vmem:[%s2898_s4 + $0x38] sm:$0x1] %v258_v32  ;;  %v384_v32 = vsel %vm133_vm7, %v383_v29, %v382_v30  ;;  %v457_v29 = vld [vmem:[%s2897_s0 + $0x1a] sm:$0x1]  ;;  %v552_v30 = vrot.slane %v456_v26, 6 }
 0x123   :  { %1718 = vmatpush3.bf16.msra.mxu1 %v1916_v3 }
 0x124   :  { %1719 = vmatprep.subr.bf16.mxu1 %v1864_v0 }
 0x127   :  { %1720 = vmatpush3.bf16.msra.mxu1 %v1925_v4 }
 0x128   :  { %1721 = vmatprep.subr.bf16.mxu1 %v1864_v0 }
 0x12b   :  { %1722 = vmatpush3.bf16.msra.mxu1 %v1934_v5 }
 0x12c   :  { %1723 = vmatprep.subr.bf16.mxu1 %v1864_v0 }
 0x12f   :  { %1724 = vmatpush3.bf16.msra.mxu1 %v1943_v6 }
 0x130   :  { %1725 = vmatprep.subr.bf16.mxu1 %v1864_v0 }
 0x133   :  { %1726 = vmatpush3.bf16.msra.mxu1 %v1952_v7 }
 0x134   :  { %1727 = vmatprep.subr.bf16.mxu1 %v1864_v0 }
 0x137   :  { %1728 = vmatpush3.bf16.msra.mxu1 %v1961_v8 }
 0x138   :  { %1753 = vmatprep.subr.bf16.mxu1 %v1864_v0 }
 0x1ed   :  { %v349_v55 = vpop.f32.mrb[0].mxu1 }
 0x1ee   :  { %v350_v56 = vadd.f32 %v349_v55, %v313_v54  ;;  %v1691_v57 = vpop.f32.mrb[1].mxu1  ;;  %v465_v54 = vld [vmem:[%s2896_s1 + $0x1a] sm:$0x1]  ;;  %v481_v55 = vrot.slane %v464_v51, 6 }
 0x1ef   :  { %v352_v58 = vpop.f32.mrb[2].mxu1  ;;  %v466_v57 = vld [vmem:[%s2896_s1 + $0x22] sm:$0x1] }
 0x1f0   :  { %v1546_v60 = vmul.f32 -1.442695, %v350_v56  ;;  %v1692_v61 = vpop.f32.mrb[3].mxu1  ;;  %v480_v56 = vsel %vm115_vm1, %v479_v52, %v462_v53  ;;  %v483_v58 = vrot.slane %v465_v54, 5 }
 0x1f1   :  { %v482_v59 = vsel %vm118_vm2, %v481_v55, %v480_v56  ;;  %v485_v61 = vrot.slane %v466_v57, 4 }
 0x1f2   :  { %1828 = vpow2.f32 %v1546_v60  ;;  %v467_v60 = vld [vmem:[%s2896_s1 + $0x2a] sm:$0x1]  ;;  %v484_v62 = vsel %vm121_vm3, %v483_v58, %v482_v59 }
 0x1f3   :  { %v487_v10 = vrot.slane %v467_v60, 3  ;;  %v486_v11 = vsel %vm124_vm4, %v485_v61, %v484_v62 }
 0x1f5   :  { %v488_v14 = vsel %vm127_vm5, %v487_v10, %v486_v11 }
 0x1f6   :  { %v490_v16 = vsel %vm130_vm6, %v489_v13, %v488_v14  ;;  %v642_v13 = vld [vmem:[%s2896_s1 + $0xb] sm:$0x1]  ;;  %v643_v14 = vld [vmem:[%s2896_s1 + $0x13] sm:$0x1] }
 0x1fc   :  { %v1829_v17 = vpop.eup %1828 }
 0x1fd   :  { %v358_v22 = vadd.f32 1.0, %v1829_v17  ;;  %v492_v17 = vsel %vm133_vm7, %v491_v15, %v490_v16  ;;  %v658_v15 = vrot.slane %v642_v13, 7  ;;  %v641_v16 = vld [vmem:[%s2896_s1 + $0x3] sm:$0x1] }
 0x1ff   :  { %1830 = vrcp.f32 %v358_v22 }
 0x209   :  { %v1831_v31 = vpop.eup %1830 }
 0x20a   :  { %v361_v33 = vsub.f32 1.0, %v1831_v31  ;;  %v386_v34 = vmul.f32 %v1831_v31, %v384_v32  ;;  %v551_v31 = vsel %vm115_vm1, %v550_v27, %v454_v28  ;;  %v458_v32 = vld [vmem:[%s2897_s0 + $0x22] sm:$0x1]  ;;  %v647_v27 = vld [vmem:[%s2896_s1 + $0x33] sm:$0x1] }
 0x20c   :  { %v362_v35 = vmul.f32 %v361_v33, %v2060_v19  ;;  %v554_v33 = vrot.slane %v457_v29, 5 }
 0x20e   :  { %v2178_v36 = vadd.f32 %v386_v34, %v362_v35  ;;  %v553_v34 = vsel %vm118_vm2, %v552_v30, %v551_v31  ;;  %v648_v30 = vld [vmem:[%s2896_s1 + $0x3b] sm:$0x1]  ;;  %v668_v31 = vrot.slane %v647_v27, 2 }
 0x210   :  { %v389_v37 = vcombine.high %v2178_v36, %v2178_v36  ;;  %v396_v38 = vrot.slane %v2178_v36, %v2058_v18  ;;  %v470_v39 = vpack.c.bf16 %v2178_v36, %v2178_v36 }
 0x212   :  { %v403_v40 = vrot.slane %v389_v37, %v2058_v18  ;;  %v404_v41 = vcombine.high %v396_v38, %v396_v38  ;;  %v412_v42 = vrot.slane %v396_v38, %v2058_v18  ;;  %1547 = vst.sshfl [vmem:[%s2898_s4 + $0x1] sm:$0x1 pattern:$0x73625140] %v396_v38  ;;  %1710 = vmatmul.mubr.bf16.vlgmr.msra.gmra.mrb[4].mxu0 %v470_v39  ;;  %v459_v37 = vld [vmem:[%s2897_s0 + $0x2a] sm:$0x1] }
 0x213   :  { %1734 = vmatpush3.bf16.msra.mxu0 %v1896_v1  ;;  %1749 = vmatprep.mubr.msk.bf16.mxu0 %vm1865_vm0, %v1864_v0  ;;  %v556_v38 = vrot.slane %v458_v32, 4 }
 0x214   :  { %v405_v19 = vcombine.high %v403_v40, %v403_v40  ;;  %v419_v43 = vrot.slane %v403_v40, %v2058_v18  ;;  %v426_v44 = vrot.slane %v404_v41, %v2058_v18  ;;  %v434_v45 = vcombine.high %v412_v42, %v412_v42  ;;  %1548 = vst.sshfl [vmem:[%s2898_s4 + $0x9] sm:$0x1 pattern:$0x73625140] %v404_v41  ;;  %v460_v41 = vld [vmem:[%s2897_s0 + $0x32] sm:$0x1] }
 0x215   :  { %1549 = vst.sshfl [vmem:[%s2898_s4 + $0x21] sm:$0x1 pattern:$0x73625140] %v403_v40  ;;  %1735 = vmatprep.subr.bf16.mxu0 %v1864_v0  ;;  %v555_v40 = vsel %vm121_vm3, %v554_v33, %v553_v34  ;;  %v558_v42 = vrot.slane %v459_v37, 3  ;;  %v670_v33 = vrot.slane %v648_v30, 1 }
 0x216   :  { %v433_v46 = vrot.slane %v405_v19, %v2058_v18  ;;  %v435_v47 = vcombine.high %v419_v43, %v419_v43  ;;  %v436_v48 = vcombine.high %v426_v44, %v426_v44  ;;  %448 = vst [vmem:[%s2898_s4 + $0x11] sm:$0x1] %v434_v45  ;;  %1550 = vst.sshfl [vmem:[%s2898_s4 + $0x29] sm:$0x1 pattern:$0x73625140] %v405_v19 }
 0x217   :  { %1736 = vmatpush3.bf16.msra.mxu0 %v1907_v2  ;;  %v557_v19 = vsel %vm124_vm4, %v556_v38, %v555_v40  ;;  %v461_v43 = vld [vmem:[%s2897_s0 + $0x3a] sm:$0x1]  ;;  %v560_v44 = vrot.slane %v460_v41, 2  ;;  %v634_v41 = vld [vmem:[%s2897_s0 + $0xb] sm:$0x1] }
 0x218   :  { %v437_v49 = vcombine.high %v433_v46, %v433_v46  ;;  %449 = vst [vmem:[%s2898_s4 + $0x19] sm:$0x1] %v436_v48  ;;  %452 = vst [vmem:[%s2898_s4 + $0x31] sm:$0x1] %v435_v47  ;;  %1737 = vmatprep.subr.bf16.mxu0 %v1864_v0  ;;  %v559_v45 = vsel %vm127_vm5, %v558_v42, %v557_v19  ;;  %v562_v46 = vrot.slane %v461_v43, 1 }
 0x219   :  { %v561_v47 = vsel %vm130_vm6, %v560_v44, %v559_v45  ;;  %v635_v43 = vld [vmem:[%s2897_s0 + $0x13] sm:$0x1]  ;;  %v729_v44 = vrot.slane %v634_v41, 7  ;;  %v633_v45 = vld [vmem:[%s2897_s0 + $0x3] sm:$0x1] }
 0x21a   :  { %453 = vst [vmem:[%s2898_s4 + $0x39] sm:$0x1] %v437_v49  ;;  %v563_v49 = vsel %vm133_vm7, %v562_v46, %v561_v47  ;;  %v636_v46 = vld [vmem:[%s2897_s0 + $0x1b] sm:$0x1]  ;;  %v731_v47 = vrot.slane %v635_v43, 6 }
 0x21b   :  { %1738 = vmatpush3.bf16.msra.mxu0 %v1916_v3  ;;  %v824_v30 = vld [vmem:[%s2896_s1 + $0x24] sm:$0x1] }
 0x21c   :  { %1739 = vmatprep.subr.bf16.mxu0 %v1864_v0 }
 0x21f   :  { %1740 = vmatpush3.bf16.msra.mxu0 %v1925_v4 }
 0x220   :  { %1741 = vmatprep.subr.bf16.mxu0 %v1864_v0 }
 0x223   :  { %1742 = vmatpush3.bf16.msra.mxu0 %v1934_v5 }
 0x224   :  { %1743 = vmatprep.subr.bf16.mxu0 %v1864_v0 }
 0x227   :  { %1744 = vmatpush3.bf16.msra.mxu0 %v1943_v6 }
 0x228   :  { %1745 = vmatprep.subr.bf16.mxu0 %v1864_v0 }
 0x22b   :  { %1746 = vmatpush3.bf16.msra.mxu0 %v1952_v7 }
 0x22c   :  { %1747 = vmatprep.subr.bf16.mxu0 %v1864_v0 }
 0x22f   :  { %1748 = vmatpush3.bf16.msra.mxu0 %v1961_v8 }
 0x230   :  { %1773 = vmatprep.subr.bf16.mxu0 %v1864_v0 }
 0x2e5   :  { %v528_v20 = vpop.f32.mrb[4].mxu0 }
 0x2e6   :  { %v529_v21 = vadd.f32 %v528_v20, %v492_v17  ;;  %v1711_v22 = vpop.f32.mrb[5].mxu0  ;;  %v644_v17 = vld [vmem:[%s2896_s1 + $0x1b] sm:$0x1]  ;;  %v660_v20 = vrot.slane %v643_v14, 6 }
 0x2e7   :  { %v531_v23 = vpop.f32.mrb[6].mxu0  ;;  %v645_v22 = vld [vmem:[%s2896_s1 + $0x23] sm:$0x1] }
 0x2e8   :  { %v1551_v25 = vmul.f32 -1.442695, %v529_v21  ;;  %v1712_v9 = vpop.f32.mrb[7].mxu0  ;;  %v659_v21 = vsel %vm115_vm1, %v658_v15, %v641_v16  ;;  %v662_v23 = vrot.slane %v644_v17, 5 }
 0x2e9   :  { %v661_v24 = vsel %vm118_vm2, %v660_v20, %v659_v21  ;;  %v664_v9 = vrot.slane %v645_v22, 4 }
 0x2ea   :  { %1832 = vpow2.f32 %v1551_v25  ;;  %v646_v25 = vld [vmem:[%s2896_s1 + $0x2b] sm:$0x1]  ;;  %v663_v26 = vsel %vm121_vm3, %v662_v23, %v661_v24 }
 0x2eb   :  { %v666_v28 = vrot.slane %v646_v25, 3  ;;  %v665_v29 = vsel %vm124_vm4, %v664_v9, %v663_v26 }
 0x2ed   :  { %v667_v32 = vsel %vm127_vm5, %v666_v28, %v665_v29 }
 0x2ee   :  { %v669_v34 = vsel %vm130_vm6, %v668_v31, %v667_v32 }
 0x2f4   :  { %v1833_v35 = vpop.eup %1832 }
 0x2f5   :  { %v537_v39 = vadd.f32 1.0, %v1833_v35  ;;  %v671_v35 = vsel %vm133_vm7, %v670_v33, %v669_v34  ;;  %v825_v33 = vld [vmem:[%s2896_s1 + $0x2c] sm:$0x1]  ;;  %v843_v34 = vrot.slane %v824_v30, 4 }
 0x2f7   :  { %1834 = vrcp.f32 %v537_v39 }
 0x301   :  { %v1835_v48 = vpop.eup %1834 }
 0x302   :  { %v540_v50 = vsub.f32 1.0, %v1835_v48  ;;  %v565_v51 = vmul.f32 %v1835_v48, %v563_v49  ;;  %v730_v48 = vsel %vm115_vm1, %v729_v44, %v633_v45  ;;  %v637_v49 = vld [vmem:[%s2897_s0 + $0x23] sm:$0x1] }
 0x304   :  { %v541_v52 = vmul.f32 %v540_v50, %v2178_v36  ;;  %v733_v50 = vrot.slane %v636_v46, 5 }
 0x306   :  { %v2296_v53 = vadd.f32 %v565_v51, %v541_v52  ;;  %v732_v51 = vsel %vm118_vm2, %v731_v47, %v730_v48 }
 0x308   :  { %v568_v54 = vcombine.high %v2296_v53, %v2296_v53  ;;  %v575_v55 = vrot.slane %v2296_v53, %v2058_v18  ;;  %v649_v56 = vpack.c.bf16 %v2296_v53, %v2296_v53 }
 0x30a   :  { %v582_v57 = vrot.slane %v568_v54, %v2058_v18  ;;  %v583_v58 = vcombine.high %v575_v55, %v575_v55  ;;  %v591_v59 = vrot.slane %v575_v55, %v2058_v18  ;;  %1552 = vst.sshfl [vmem:[%s2898_s4 + $0x2] sm:$0x1 pattern:$0x73625140] %v575_v55  ;;  %1730 = vmatmul.mubr.bf16.vlgmr.msra.gmra.mrb[4].mxu1 %v649_v56  ;;  %v638_v54 = vld [vmem:[%s2897_s0 + $0x2b] sm:$0x1] }
 0x30b   :  { %1754 = vmatpush3.bf16.msra.mxu1 %v1896_v1  ;;  %1769 = vmatprep.mubr.msk.bf16.mxu1 %vm1865_vm0, %v1864_v0  ;;  %v735_v55 = vrot.slane %v637_v49, 4  ;;  %v813_v49 = vld [vmem:[%s2897_s0 + $0xc] sm:$0x1] }
 0x30c   :  { %v584_v36 = vcombine.high %v582_v57, %v582_v57  ;;  %v598_v60 = vrot.slane %v582_v57, %v2058_v18  ;;  %v605_v61 = vrot.slane %v583_v58, %v2058_v18  ;;  %v613_v62 = vcombine.high %v591_v59, %v591_v59  ;;  %1553 = vst.sshfl [vmem:[%s2898_s4 + $0xa] sm:$0x1 pattern:$0x73625140] %v583_v58  ;;  %v639_v58 = vld [vmem:[%s2897_s0 + $0x33] sm:$0x1] }
 0x30d   :  { %1554 = vst.sshfl [vmem:[%s2898_s4 + $0x22] sm:$0x1 pattern:$0x73625140] %v582_v57  ;;  %1755 = vmatprep.subr.bf16.mxu1 %v1864_v0  ;;  %v734_v57 = vsel %vm121_vm3, %v733_v50, %v732_v51  ;;  %v737_v59 = vrot.slane %v638_v54, 3  ;;  %v908_v54 = vrot.slane %v813_v49, 7 }
 0x30e   :  { %v612_v63 = vrot.slane %v584_v36, %v2058_v18  ;;  %v614_v10 = vcombine.high %v598_v60, %v598_v60  ;;  %v615_v11 = vcombine.high %v605_v61, %v605_v61  ;;  %627 = vst [vmem:[%s2898_s4 + $0x12] sm:$0x1] %v613_v62  ;;  %1555 = vst.sshfl [vmem:[%s2898_s4 + $0x2a] sm:$0x1 pattern:$0x73625140] %v584_v36 }
 0x30f   :  { %1756 = vmatpush3.bf16.msra.mxu1 %v1907_v2  ;;  %v736_v36 = vsel %vm124_vm4, %v735_v55, %v734_v57  ;;  %v640_v60 = vld [vmem:[%s2897_s0 + $0x3b] sm:$0x1]  ;;  %v739_v61 = vrot.slane %v639_v58, 2  ;;  %v812_v55 = vld [vmem:[%s2897_s0 + $0x4] sm:$0x1] }
 0x310   :  { %v616_v12 = vcombine.high %v612_v63, %v612_v63  ;;  %628 = vst [vmem:[%s2898_s4 + $0x1a] sm:$0x1] %v615_v11  ;;  %631 = vst [vmem:[%s2898_s4 + $0x32] sm:$0x1] %v614_v10  ;;  %1757 = vmatprep.subr.bf16.mxu1 %v1864_v0  ;;  %v738_v62 = vsel %vm127_vm5, %v737_v59, %v736_v36  ;;  %v741_v63 = vrot.slane %v640_v60, 1 }
 0x311   :  { %v740_v10 = vsel %vm130_vm6, %v739_v61, %v738_v62  ;;  %v909_v58 = vsel %vm115_vm1, %v908_v54, %v812_v55  ;;  %v816_v59 = vld [vmem:[%s2897_s0 + $0x24] sm:$0x1]  ;;  %v817_v62 = vld [vmem:[%s2897_s0 + $0x2c] sm:$0x1]  ;;  %v1004_v49 = vld [vmem:[%s2896_s1 + $0x2d] sm:$0x1] }
 0x312   :  { %632 = vst [vmem:[%s2898_s4 + $0x3a] sm:$0x1] %v616_v12  ;;  %v742_v12 = vsel %vm133_vm7, %v741_v63, %v740_v10  ;;  %v914_v63 = vrot.slane %v816_v59, 4  ;;  %v1024_v54 = vrot.slane %v1004_v49, 3 }
 0x313   :  { %1758 = vmatpush3.bf16.msra.mxu1 %v1916_v3 }
 0x314   :  { %1759 = vmatprep.subr.bf16.mxu1 %v1864_v0 }
 0x317   :  { %1760 = vmatpush3.bf16.msra.mxu1 %v1925_v4 }
 0x318   :  { %1761 = vmatprep.subr.bf16.mxu1 %v1864_v0 }
 0x31b   :  { %1762 = vmatpush3.bf16.msra.mxu1 %v1934_v5 }
 0x31c   :  { %1763 = vmatprep.subr.bf16.mxu1 %v1864_v0 }
 0x31f   :  { %1764 = vmatpush3.bf16.msra.mxu1 %v1943_v6 }
 0x320   :  { %1765 = vmatprep.subr.bf16.mxu1 %v1864_v0 }
 0x323   :  { %1766 = vmatpush3.bf16.msra.mxu1 %v1952_v7 }
 0x324   :  { %1767 = vmatprep.subr.bf16.mxu1 %v1864_v0 }
 0x327   :  { %1768 = vmatpush3.bf16.msra.mxu1 %v1961_v8 }
 0x328   :  { %1793 = vmatprep.subr.bf16.mxu1 %v1864_v0 }
 0x3dd   :  { %v707_v37 = vpop.f32.mrb[4].mxu1 }
 0x3de   :  { %v708_v38 = vadd.f32 %v707_v37, %v671_v35  ;;  %v1731_v39 = vpop.f32.mrb[5].mxu1  ;;  %v826_v37 = vld [vmem:[%s2896_s1 + $0x34] sm:$0x1] }
 0x3df   :  { %v710_v40 = vpop.f32.mrb[6].mxu1  ;;  %v847_v41 = vrot.slane %v826_v37, 2  ;;  %v1860_v37 = vld [vmem:[%s2894_s3 + $0x20] sm:$0xff]  }
 0x3e0   :  { %v1556_v42 = vmul.f32 -1.442695, %v708_v38  ;;  %v1732_v19 = vpop.f32.mrb[7].mxu1  ;;  %v845_v38 = vrot.slane %v825_v33, 3  ;;  %v827_v40 = vld [vmem:[%s2896_s1 + $0x3c] sm:$0x1] }
 0x3e1   :  { %v849_v19 = vrot.slane %v827_v40, 1  ;;  %v1863_v40 = vld [vmem:[%s2894_s3 + $0x38] sm:$0xff]  }
 0x3e2   :  { %1836 = vpow2.f32 %v1556_v42 }
 0x3ec   :  { %v1837_v52 = vpop.eup %1836 }
 0x3ed   :  { %v716_v56 = vadd.f32 1.0, %v1837_v52  ;;  %v814_v52 = vld [vmem:[%s2897_s0 + $0x14] sm:$0x1] }
 0x3ee   :  { %v910_v57 = vrot.slane %v814_v52, 6  ;;  %v1005_v52 = vld [vmem:[%s2896_s1 + $0x35] sm:$0x1] }
 0x3ef   :  { %1838 = vrcp.f32 %v716_v56  ;;  %v815_v56 = vld [vmem:[%s2897_s0 + $0x1c] sm:$0x1] }
 0x3f0   :  { %v912_v36 = vrot.slane %v815_v56, 5  ;;  %v911_v60 = vsel %vm118_vm2, %v910_v57, %v909_v58  ;;  %v1006_v56 = vld [vmem:[%s2896_s1 + $0x3d] sm:$0x1]  ;;  %v1026_v57 = vrot.slane %v1005_v52, 2 }
 0x3f1   :  { %v1028_v59 = vrot.slane %v1006_v56, 1 }
 0x3f9   :  { %v1839_v11 = vpop.eup %1838 }
 0x3fa   :  { %v719_v13 = vsub.f32 1.0, %v1839_v11  ;;  %v744_v14 = vmul.f32 %v1839_v11, %v742_v12  ;;  %v913_v11 = vsel %vm121_vm3, %v912_v36, %v911_v60  ;;  %v818_v12 = vld [vmem:[%s2897_s0 + $0x34] sm:$0x1] }
 0x3fc   :  { %v720_v15 = vmul.f32 %v719_v13, %v2296_v53  ;;  %v916_v13 = vrot.slane %v817_v62, 3 }
 0x3fe   :  { %v2414_v16 = vadd.f32 %v744_v14, %v720_v15  ;;  %v915_v14 = vsel %vm124_vm4, %v914_v63, %v913_v11  ;;  %v819_v15 = vld [vmem:[%s2897_s0 + $0x3c] sm:$0x1]  ;;  %v992_v11 = vld [vmem:[%s2897_s0 + $0xd] sm:$0x1] }
 0x400   :  { %v747_v17 = vcombine.high %v2414_v16, %v2414_v16  ;;  %v754_v20 = vrot.slane %v2414_v16, %v2058_v18  ;;  %v828_v21 = vpack.c.bf16 %v2414_v16, %v2414_v16 }
 0x402   :  { %v761_v22 = vrot.slane %v747_v17, %v2058_v18  ;;  %v762_v23 = vcombine.high %v754_v20, %v754_v20  ;;  %v770_v24 = vrot.slane %v754_v20, %v2058_v18  ;;  %1557 = vst.sshfl [vmem:[%s2898_s4 + $0x3] sm:$0x1 pattern:$0x73625140] %v754_v20  ;;  %1750 = vmatmul.mubr.bf16.vlgmr.msra.gmra.mrb[8].mxu0 %v828_v21  ;;  %v918_v17 = vrot.slane %v818_v12, 2 }
 0x403   :  { %1774 = vmatpush3.bf16.msra.mxu0 %v1896_v1  ;;  %1789 = vmatprep.mubr.msk.bf16.mxu0 %vm1865_vm0, %v1864_v0  ;;  %v917_v20 = vsel %vm127_vm5, %v916_v13, %v915_v14  ;;  %v920_v21 = vrot.slane %v819_v15, 1  ;;  %v993_v14 = vld [vmem:[%s2897_s0 + $0x15] sm:$0x1]  ;;  %v1087_v15 = vrot.slane %v992_v11, 7 }
 0x404   :  { %v763_v53 = vcombine.high %v761_v22, %v761_v22  ;;  %v777_v25 = vrot.slane %v761_v22, %v2058_v18  ;;  %v784_v9 = vrot.slane %v762_v23, %v2058_v18  ;;  %v792_v26 = vcombine.high %v770_v24, %v770_v24  ;;  %1558 = vst.sshfl [vmem:[%s2898_s4 + $0xb] sm:$0x1 pattern:$0x73625140] %v762_v23 }
 0x405   :  { %1559 = vst.sshfl [vmem:[%s2898_s4 + $0x23] sm:$0x1 pattern:$0x73625140] %v761_v22  ;;  %1775 = vmatprep.subr.bf16.mxu0 %v1864_v0  ;;  %v919_v22 = vsel %vm130_vm6, %v918_v17, %v917_v20  ;;  %v991_v17 = vld [vmem:[%s2897_s0 + $0x5] sm:$0x1] }
 0x406   :  { %v791_v1 = vrot.slane %v763_v53, %v2058_v18  ;;  %v793_v27 = vcombine.high %v777_v25, %v777_v25  ;;  %v794_v28 = vcombine.high %v784_v9, %v784_v9  ;;  %806 = vst [vmem:[%s2898_s4 + $0x13] sm:$0x1] %v792_v26  ;;  %1560 = vst.sshfl [vmem:[%s2898_s4 + $0x2b] sm:$0x1 pattern:$0x73625140] %v763_v53 }
 0x407   :  { %1776 = vmatpush3.bf16.msra.mxu0 %v1907_v2  ;;  %v821_v2 = vld [vmem:[%s2896_s1 + $0xc] sm:$0x1]  ;;  %v921_v24 = vsel %vm133_vm7, %v920_v21, %v919_v22  ;;  %v994_v20 = vld [vmem:[%s2897_s0 + $0x1d] sm:$0x1]  ;;  %v1089_v21 = vrot.slane %v993_v14, 6  ;;  %v1088_v22 = vsel %vm115_vm1, %v1087_v15, %v991_v17 }
 0x408   :  { %v795_v29 = vcombine.high %v791_v1, %v791_v1  ;;  %807 = vst [vmem:[%s2898_s4 + $0x1b] sm:$0x1] %v794_v28  ;;  %810 = vst [vmem:[%s2898_s4 + $0x33] sm:$0x1] %v793_v27  ;;  %1777 = vmatprep.subr.bf16.mxu0 %v1864_v0 }
 0x40a   :  { %811 = vst [vmem:[%s2898_s4 + $0x3b] sm:$0x1] %v795_v29 }
 0x40b   :  { %1778 = vmatpush3.bf16.msra.mxu0 %v1916_v3  ;;  %v822_v3 = vld [vmem:[%s2896_s1 + $0x14] sm:$0x1] }
 0x40c   :  { %1779 = vmatprep.subr.bf16.mxu0 %v1864_v0 }
 0x40f   :  { %1780 = vmatpush3.bf16.msra.mxu0 %v1925_v4  ;;  %v837_v4 = vrot.slane %v821_v2, 7 }
 0x410   :  { %1781 = vmatprep.subr.bf16.mxu0 %v1864_v0 }
 0x413   :  { %1782 = vmatpush3.bf16.msra.mxu0 %v1934_v5  ;;  %v820_v5 = vld [vmem:[%s2896_s1 + $0x4] sm:$0x1] }
 0x414   :  { %1783 = vmatprep.subr.bf16.mxu0 %v1864_v0 }
 0x417   :  { %1784 = vmatpush3.bf16.msra.mxu0 %v1943_v6  ;;  %v823_v6 = vld [vmem:[%s2896_s1 + $0x1c] sm:$0x1] }
 0x418   :  { %1785 = vmatprep.subr.bf16.mxu0 %v1864_v0  ;;  %v841_v31 = vrot.slane %v823_v6, 5 }
 0x41b   :  { %1786 = vmatpush3.bf16.msra.mxu0 %v1952_v7  ;;  %v839_v7 = vrot.slane %v822_v3, 6 }
 0x41c   :  { %1787 = vmatprep.subr.bf16.mxu0 %v1864_v0 }
 0x41f   :  { %1788 = vmatpush3.bf16.msra.mxu0 %v1961_v8  ;;  %v838_v8 = vsel %vm115_vm1, %v837_v4, %v820_v5 }
 0x420   :  { %v840_v32 = vsel %vm118_vm2, %v839_v7, %v838_v8 }
 0x421   :  { %v842_v35 = vsel %vm121_vm3, %v841_v31, %v840_v32  ;;  %v1857_v32 = vld [vmem:[%s2894_s3 + $0x8] sm:$0xff]  }
 0x422   :  { %v844_v39 = vsel %vm124_vm4, %v843_v34, %v842_v35  ;;  %v1858_v34 = vld [vmem:[%s2894_s3 + $0x10] sm:$0xff]   ;;  %v1859_v35 = vld [vmem:[%s2894_s3 + $0x18] sm:$0xff]  }
 0x423   :  { %v846_v42 = vsel %vm127_vm5, %v845_v38, %v844_v39  ;;  %v1861_v38 = vld [vmem:[%s2894_s3 + $0x28] sm:$0xff]   ;;  %v1862_v39 = vld [vmem:[%s2894_s3 + $0x30] sm:$0xff]  }
 0x424   :  { %v848_v43 = vsel %vm130_vm6, %v847_v41, %v846_v42  ;;  %v1000_v41 = vld [vmem:[%s2896_s1 + $0xd] sm:$0x1]  ;;  %v1001_v42 = vld [vmem:[%s2896_s1 + $0x15] sm:$0x1] }
 0x425   :  { %v850_v44 = vsel %vm133_vm7, %v849_v19, %v848_v43  ;;  %v1016_v19 = vrot.slane %v1000_v41, 7  ;;  %v999_v43 = vld [vmem:[%s2896_s1 + $0x5] sm:$0x1] }
 0x4d5   :  { %v886_v45 = vpop.f32.mrb[8].mxu0 }
 0x4d6   :  { %v887_v46 = vadd.f32 %v886_v45, %v850_v44  ;;  %v1751_v47 = vpop.f32.mrb[9].mxu0  ;;  %v1018_v44 = vrot.slane %v1001_v42, 6  ;;  %v1017_v45 = vsel %vm115_vm1, %v1016_v19, %v999_v43 }
 0x4d7   :  { %v889_v48 = vpop.f32.mrb[10].mxu0 }
 0x4d8   :  { %v1561_v50 = vmul.f32 -1.442695, %v887_v46  ;;  %v1752_v51 = vpop.f32.mrb[11].mxu0  ;;  %v1003_v46 = vld [vmem:[%s2896_s1 + $0x25] sm:$0x1]  ;;  %v1019_v48 = vsel %vm118_vm2, %v1018_v44, %v1017_v45 }
 0x4da   :  { %1840 = vpow2.f32 %v1561_v50  ;;  %v1022_v50 = vrot.slane %v1003_v46, 4 }
 0x4e4   :  { %v1841_v61 = vpop.eup %1840 }
 0x4e5   :  { %v895_v10 = vadd.f32 1.0, %v1841_v61 }
 0x4e7   :  { %1842 = vrcp.f32 %v895_v10 }
 0x4f1   :  { %v1843_v23 = vpop.eup %1842 }
 0x4f2   :  { %v898_v53 = vsub.f32 1.0, %v1843_v23  ;;  %v923_v25 = vmul.f32 %v1843_v23, %v921_v24  ;;  %v995_v23 = vld [vmem:[%s2897_s0 + $0x25] sm:$0x1]  ;;  %v1091_v24 = vrot.slane %v994_v20, 5 }
 0x4f4   :  { %v899_v9 = vmul.f32 %v898_v53, %v2414_v16  ;;  %v1856_v16 = vld [vmem:[%s2894_s3] sm:$0xff]   ;;  %v1090_v53 = vsel %vm118_vm2, %v1089_v21, %v1088_v22  ;;  %v1171_v22 = vld [vmem:[%s2897_s0 + $0xe] sm:$0x1] }
 0x4f6   :  { %v2531_v26 = vadd.f32 %v923_v25, %v899_v9  ;;  %v996_v9 = vld [vmem:[%s2897_s0 + $0x2d] sm:$0x1] }
 0x4f8   :  { %v926_v1 = vcombine.high %v2531_v26, %v2531_v26  ;;  %v933_v27 = vrot.slane %v2531_v26, %v2058_v18  ;;  %v1007_v28 = vpack.c.bf16 %v2531_v26, %v2531_v26 }
 0x4fa   :  { %v940_v29 = vrot.slane %v926_v1, %v2058_v18  ;;  %v941_v2 = vcombine.high %v933_v27, %v933_v27  ;;  %v949_v3 = vrot.slane %v933_v27, %v2058_v18  ;;  %1562 = vst.sshfl [vmem:[%s2898_s4 + $0x4] sm:$0x1 pattern:$0x73625140] %v933_v27  ;;  %1770 = vmatmul.mubr.bf16.vlgmr.msra.gmra.mrb[8].mxu1 %v1007_v28  ;;  %v1093_v1 = vrot.slane %v995_v23, 4 }
 0x4fb   :  { %1794 = vmatpush3.bf16.msra.mxu1 %v1856_v16  ;;  %1809 = vmatprep.mubr.msk.bf16.mxu1 %vm1865_vm0, %v1864_v0  ;;  %v1092_v28 = vsel %vm121_vm3, %v1091_v24, %v1090_v53  ;;  %v998_v16 = vld [vmem:[%s2897_s0 + $0x3d] sm:$0x1]  ;;  %v1172_v53 = vld [vmem:[%s2897_s0 + $0x16] sm:$0x1] }
 0x4fc   :  { %v942_v4 = vcombine.high %v940_v29, %v940_v29  ;;  %v956_v5 = vrot.slane %v940_v29, %v2058_v18  ;;  %v963_v6 = vrot.slane %v941_v2, %v2058_v18  ;;  %v971_v7 = vcombine.high %v949_v3, %v949_v3  ;;  %1563 = vst.sshfl [vmem:[%s2898_s4 + $0xc] sm:$0x1 pattern:$0x73625140] %v941_v2 }
 0x4fd   :  { %1564 = vst.sshfl [vmem:[%s2898_s4 + $0x24] sm:$0x1 pattern:$0x73625140] %v940_v29  ;;  %1795 = vmatprep.subr.bf16.mxu1 %v1864_v0  ;;  %v997_v29 = vld [vmem:[%s2897_s0 + $0x35] sm:$0x1]  ;;  %v1094_v3 = vsel %vm124_vm4, %v1093_v1, %v1092_v28 }
 0x4fe   :  { %v970_v8 = vrot.slane %v942_v4, %v2058_v18  ;;  %v972_v30 = vcombine.high %v956_v5, %v956_v5  ;;  %v973_v31 = vcombine.high %v963_v6, %v963_v6  ;;  %985 = vst [vmem:[%s2898_s4 + $0x14] sm:$0x1] %v971_v7  ;;  %1565 = vst.sshfl [vmem:[%s2898_s4 + $0x2c] sm:$0x1 pattern:$0x73625140] %v942_v4 }
 0x4ff   :  { %1796 = vmatpush3.bf16.msra.mxu1 %v1857_v32  ;;  %v1095_v2 = vrot.slane %v996_v9, 3  ;;  %v1097_v4 = vrot.slane %v997_v29, 2  ;;  %v1099_v6 = vrot.slane %v998_v16, 1  ;;  %v1170_v9 = vld [vmem:[%s2897_s0 + $0x6] sm:$0x1] }
 0x500   :  { %v974_v33 = vcombine.high %v970_v8, %v970_v8  ;;  %986 = vst [vmem:[%s2898_s4 + $0x1c] sm:$0x1] %v973_v31  ;;  %989 = vst [vmem:[%s2898_s4 + $0x34] sm:$0x1] %v972_v30  ;;  %1797 = vmatprep.subr.bf16.mxu1 %v1864_v0  ;;  %v1173_v1 = vld [vmem:[%s2897_s0 + $0x1e] sm:$0x1] }
 0x501   :  { %v1096_v5 = vsel %vm127_vm5, %v1095_v2, %v1094_v3  ;;  %v1174_v29 = vld [vmem:[%s2897_s0 + $0x26] sm:$0x1]  ;;  %v1270_v2 = vrot.slane %v1173_v1, 5 }
 0x502   :  { %990 = vst [vmem:[%s2898_s4 + $0x3c] sm:$0x1] %v974_v33  ;;  %v1098_v7 = vsel %vm130_vm6, %v1097_v4, %v1096_v5  ;;  %v1175_v4 = vld [vmem:[%s2897_s0 + $0x2e] sm:$0x1]  ;;  %v1272_v5 = vrot.slane %v1174_v29, 4 }
 0x503   :  { %1798 = vmatpush3.bf16.msra.mxu1 %v1858_v34  ;;  %v1100_v30 = vsel %vm133_vm7, %v1099_v6, %v1098_v7 }
 0x504   :  { %1799 = vmatprep.subr.bf16.mxu1 %v1864_v0 }
 0x507   :  { %1800 = vmatpush3.bf16.msra.mxu1 %v1859_v35 }
 0x508   :  { %1801 = vmatprep.subr.bf16.mxu1 %v1864_v0 }
 0x50b   :  { %1802 = vmatpush3.bf16.msra.mxu1 %v1860_v37 }
 0x50c   :  { %1803 = vmatprep.subr.bf16.mxu1 %v1864_v0 }
 0x50f   :  { %1804 = vmatpush3.bf16.msra.mxu1 %v1861_v38 }
 0x510   :  { %1805 = vmatprep.subr.bf16.mxu1 %v1864_v0 }
 0x513   :  { %1806 = vmatpush3.bf16.msra.mxu1 %v1862_v39 }
 0x514   :  { %1807 = vmatprep.subr.bf16.mxu1 %v1864_v0  ;;  %v1002_v0 = vld [vmem:[%s2896_s1 + $0x1d] sm:$0x1] }
 0x515   :  { %v1020_v47 = vrot.slane %v1002_v0, 5 }
 0x517   :  { %1808 = vmatpush3.bf16.msra.mxu1 %v1863_v40  ;;  %v1021_v51 = vsel %vm121_vm3, %v1020_v47, %v1019_v48  ;;  %v1179_v47 = vld [vmem:[%s2896_s1 + $0xe] sm:$0x1]  ;;  %v1180_v48 = vld [vmem:[%s2896_s1 + $0x16] sm:$0x1] }
 0x518   :  { %v1023_v55 = vsel %vm124_vm4, %v1022_v50, %v1021_v51  ;;  %v1195_v49 = vrot.slane %v1179_v47, 7  ;;  %v1178_v50 = vld [vmem:[%s2896_s1 + $0x6] sm:$0x1]  ;;  %v1181_v51 = vld [vmem:[%s2896_s1 + $0x1e] sm:$0x1]  ;;  %v1197_v52 = vrot.slane %v1180_v48, 6 }
 0x519   :  { %v1025_v58 = vsel %vm127_vm5, %v1024_v54, %v1023_v55  ;;  %v1182_v55 = vld [vmem:[%s2896_s1 + $0x26] sm:$0x1]  ;;  %v1199_v56 = vrot.slane %v1181_v51, 5 }
 0x51a   :  { %v1027_v36 = vsel %vm130_vm6, %v1026_v57, %v1025_v58  ;;  %v1196_v54 = vsel %vm115_vm1, %v1195_v49, %v1178_v50  ;;  %v1183_v58 = vld [vmem:[%s2896_s1 + $0x2e] sm:$0x1] }
 0x51b   :  { %v1029_v60 = vsel %vm133_vm7, %v1028_v59, %v1027_v36  ;;  %v1198_v57 = vsel %vm118_vm2, %v1197_v52, %v1196_v54  ;;  %v1201_v59 = vrot.slane %v1182_v55, 4 }
 0x51c   :  { %v1200_v36 = vsel %vm121_vm3, %v1199_v56, %v1198_v57  ;;  %v1358_v56 = vld [vmem:[%s2896_s1 + $0xf] sm:$0x1]  ;;  %v1359_v57 = vld [vmem:[%s2896_s1 + $0x17] sm:$0x1] }
 0x5cd   :  { %v1065_v61 = vpop.f32.mrb[8].mxu1 }
 0x5ce   :  { %v1066_v62 = vadd.f32 %v1065_v61, %v1029_v60  ;;  %v1771_v63 = vpop.f32.mrb[9].mxu1  ;;  %v1184_v60 = vld [vmem:[%s2896_s1 + $0x36] sm:$0x1]  ;;  %v1203_v61 = vrot.slane %v1183_v58, 3  ;;  %v1374_v58 = vrot.slane %v1358_v56, 7 }
 0x5cf   :  { %v1068_v10 = vpop.f32.mrb[10].mxu1  ;;  %v1185_v63 = vld [vmem:[%s2896_s1 + $0x3e] sm:$0x1] }
 0x5d0   :  { %v1566_v12 = vmul.f32 -1.442695, %v1066_v62  ;;  %v1772_v13 = vpop.f32.mrb[11].mxu1  ;;  %v1202_v62 = vsel %vm124_vm4, %v1201_v59, %v1200_v36  ;;  %v1205_v10 = vrot.slane %v1184_v60, 2  ;;  %v1357_v59 = vld [vmem:[%s2896_s1 + $0x7] sm:$0x1] }
 0x5d1   :  { %v1204_v11 = vsel %vm127_vm5, %v1203_v61, %v1202_v62  ;;  %v1360_v36 = vld [vmem:[%s2896_s1 + $0x1f] sm:$0x1]  ;;  %v1376_v60 = vrot.slane %v1359_v57, 6  ;;  %v1375_v61 = vsel %vm115_vm1, %v1374_v58, %v1357_v59  ;;  %v1361_v62 = vld [vmem:[%s2896_s1 + $0x27] sm:$0x1] }
 0x5d2   :  { %1844 = vpow2.f32 %v1566_v12  ;;  %v1207_v12 = vrot.slane %v1185_v63, 1  ;;  %v1206_v13 = vsel %vm130_vm6, %v1205_v10, %v1204_v11  ;;  %v1378_v63 = vrot.slane %v1360_v36, 5  ;;  %v1362_v11 = vld [vmem:[%s2896_s1 + $0x2f] sm:$0x1] }
 0x5d3   :  { %v1377_v10 = vsel %vm118_vm2, %v1376_v60, %v1375_v61 }
 0x5d4   :  { %v1208_v14 = vsel %vm133_vm7, %v1207_v12, %v1206_v13  ;;  %v1380_v12 = vrot.slane %v1361_v62, 4  ;;  %v1379_v13 = vsel %vm121_vm3, %v1378_v63, %v1377_v10 }
 0x5dc   :  { %v1845_v25 = vpop.eup %1844 }
 0x5dd   :  { %v1074_v27 = vadd.f32 1.0, %v1845_v25  ;;  %v1266_v25 = vrot.slane %v1171_v22, 7 }
 0x5df   :  { %1846 = vrcp.f32 %v1074_v27  ;;  %v1268_v27 = vrot.slane %v1172_v53, 6  ;;  %v1267_v28 = vsel %vm115_vm1, %v1266_v25, %v1170_v9 }
 0x5e1   :  { %v1269_v3 = vsel %vm118_vm2, %v1268_v27, %v1267_v28  ;;  %v1350_v28 = vld [vmem:[%s2897_s0 + $0xf] sm:$0x1] }
 0x5e2   :  { %v1271_v7 = vsel %vm121_vm3, %v1270_v2, %v1269_v3  ;;  %v1351_v3 = vld [vmem:[%s2897_s0 + $0x17] sm:$0x1] }
 0x5e9   :  { %v1847_v8 = vpop.eup %1846 }
 0x5ea   :  { %v1077_v31 = vsub.f32 1.0, %v1847_v8  ;;  %v1102_v32 = vmul.f32 %v1847_v8, %v1100_v30  ;;  %v1176_v8 = vld [vmem:[%s2897_s0 + $0x36] sm:$0x1]  ;;  %v1274_v30 = vrot.slane %v1175_v4, 3  ;;  %v1349_v4 = vld [vmem:[%s2897_s0 + $0x7] sm:$0x1] }
 0x5ec   :  { %v1078_v33 = vmul.f32 %v1077_v31, %v2531_v26  ;;  %v1273_v31 = vsel %vm124_vm4, %v1272_v5, %v1271_v7  ;;  %v1352_v5 = vld [vmem:[%s2897_s0 + $0x1f] sm:$0x1] }
 0x5ee   :  { %v2664_v34 = vadd.f32 %v1102_v32, %v1078_v33  ;;  %v1177_v32 = vld [vmem:[%s2897_s0 + $0x3e] sm:$0x1]  ;;  %v1276_v33 = vrot.slane %v1176_v8, 2  ;;  %v1353_v8 = vld [vmem:[%s2897_s0 + $0x27] sm:$0x1] }
 0x5f0   :  { %v1105_v35 = vcombine.high %v2664_v34, %v2664_v34  ;;  %v1112_v37 = vrot.slane %v2664_v34, %v2058_v18  ;;  %v1186_v38 = vpack.c.bf16 %v2664_v34, %v2664_v34 }
 0x5f2   :  { %v1119_v39 = vrot.slane %v1105_v35, %v2058_v18  ;;  %v1120_v40 = vcombine.high %v1112_v37, %v1112_v37  ;;  %v1128_v41 = vrot.slane %v1112_v37, %v2058_v18  ;;  %1567 = vst.sshfl [vmem:[%s2898_s4 + $0x5] sm:$0x1 pattern:$0x73625140] %v1112_v37  ;;  %1790 = vmatmul.mubr.bf16.vlgmr.msra.gmra.mrb[12].mxu0 %v1186_v38  ;;  %v1278_v37 = vrot.slane %v1177_v32, 1 }
 0x5f3   :  { %v1275_v35 = vsel %vm127_vm5, %v1274_v30, %v1273_v31  ;;  %v1449_v30 = vrot.slane %v1352_v5, 5 }
 0x5f4   :  { %v1121_v26 = vcombine.high %v1119_v39, %v1119_v39  ;;  %v1135_v42 = vrot.slane %v1119_v39, %v2058_v18  ;;  %v1142_v19 = vrot.slane %v1120_v40, %v2058_v18  ;;  %v1150_v43 = vcombine.high %v1128_v41, %v1128_v41  ;;  %1568 = vst.sshfl [vmem:[%s2898_s4 + $0xd] sm:$0x1 pattern:$0x73625140] %v1120_v40 }
 0x5f5   :  { %1569 = vst.sshfl [vmem:[%s2898_s4 + $0x25] sm:$0x1 pattern:$0x73625140] %v1119_v39  ;;  %v1277_v38 = vsel %vm130_vm6, %v1276_v33, %v1275_v35  ;;  %v1354_v33 = vld [vmem:[%s2897_s0 + $0x2f] sm:$0x1] }
 0x5f6   :  { %v1149_v0 = vrot.slane %v1121_v26, %v2058_v18  ;;  %v1151_v44 = vcombine.high %v1135_v42, %v1135_v42  ;;  %v1152_v45 = vcombine.high %v1142_v19, %v1142_v19  ;;  %1164 = vst [vmem:[%s2898_s4 + $0x15] sm:$0x1] %v1150_v43  ;;  %1570 = vst.sshfl [vmem:[%s2898_s4 + $0x2d] sm:$0x1 pattern:$0x73625140] %v1121_v26 }
 0x5f7   :  { %v1279_v40 = vsel %vm133_vm7, %v1278_v37, %v1277_v38  ;;  %v1451_v35 = vrot.slane %v1353_v8, 4 }
 0x5f8   :  { %v1153_v46 = vcombine.high %v1149_v0, %v1149_v0  ;;  %1165 = vst [vmem:[%s2898_s4 + $0x1d] sm:$0x1] %v1152_v45  ;;  %1168 = vst [vmem:[%s2898_s4 + $0x35] sm:$0x1] %v1151_v44 }
 0x5fa   :  { %1169 = vst [vmem:[%s2898_s4 + $0x3d] sm:$0x1] %v1153_v46 }
 0x6c5   :  { %v1244_v15 = vpop.f32.mrb[12].mxu0 }
 0x6c6   :  { %v1245_v17 = vadd.f32 %v1244_v15, %v1208_v14  ;;  %v1791_v20 = vpop.f32.mrb[13].mxu0  ;;  %v1363_v14 = vld [vmem:[%s2896_s1 + $0x37] sm:$0x1]  ;;  %v1382_v15 = vrot.slane %v1362_v11, 3 }
 0x6c7   :  { %v1247_v21 = vpop.f32.mrb[14].mxu0  ;;  %v1364_v20 = vld [vmem:[%s2896_s1 + $0x3f] sm:$0x1] }
 0x6c8   :  { %v1571_v23 = vmul.f32 -1.442695, %v1245_v17  ;;  %v1792_v24 = vpop.f32.mrb[15].mxu0  ;;  %v1381_v17 = vsel %vm124_vm4, %v1380_v12, %v1379_v13  ;;  %v1384_v21 = vrot.slane %v1363_v14, 2 }
 0x6c9   :  { %v1383_v22 = vsel %vm127_vm5, %v1382_v15, %v1381_v17 }
 0x6ca   :  { %1848 = vpow2.f32 %v1571_v23  ;;  %v1386_v23 = vrot.slane %v1364_v20, 1  ;;  %v1385_v24 = vsel %vm130_vm6, %v1384_v21, %v1383_v22 }
 0x6cc   :  { %v1387_v53 = vsel %vm133_vm7, %v1386_v23, %v1385_v24 }
 0x6d4   :  { %v1849_v16 = vpop.eup %1848 }
 0x6d5   :  { %v1253_v6 = vadd.f32 1.0, %v1849_v16  ;;  %v1445_v16 = vrot.slane %v1350_v28, 7 }
 0x6d7   :  { %1850 = vrcp.f32 %v1253_v6  ;;  %v1447_v6 = vrot.slane %v1351_v3, 6  ;;  %v1446_v7 = vsel %vm115_vm1, %v1445_v16, %v1349_v4 }
 0x6d9   :  { %v1448_v31 = vsel %vm118_vm2, %v1447_v6, %v1446_v7 }
 0x6da   :  { %v1450_v38 = vsel %vm121_vm3, %v1449_v30, %v1448_v31 }
 0x6e1   :  { %v1851_v39 = vpop.eup %1850 }
 0x6e2   :  { %v1256_v41 = vsub.f32 1.0, %v1851_v39  ;;  %v1281_v26 = vmul.f32 %v1851_v39, %v1279_v40  ;;  %v1355_v39 = vld [vmem:[%s2897_s0 + $0x37] sm:$0x1]  ;;  %v1453_v40 = vrot.slane %v1354_v33, 3 }
 0x6e4   :  { %v1257_v42 = vmul.f32 %v1256_v41, %v2664_v34  ;;  %v1452_v41 = vsel %vm124_vm4, %v1451_v35, %v1450_v38 }
 0x6e6   :  { %v2764_v19 = vadd.f32 %v1281_v26, %v1257_v42  ;;  %v1356_v26 = vld [vmem:[%s2897_s0 + $0x3f] sm:$0x1]  ;;  %v1455_v42 = vrot.slane %v1355_v39, 2 }
 0x6e8   :  { %v1284_v43 = vcombine.high %v2764_v19, %v2764_v19  ;;  %v1291_v0 = vrot.slane %v2764_v19, %v2058_v18  ;;  %v1365_v44 = vpack.c.bf16 %v2764_v19, %v2764_v19 }
 0x6ea   :  { %v1298_v45 = vrot.slane %v1284_v43, %v2058_v18  ;;  %v1299_v46 = vcombine.high %v1291_v0, %v1291_v0  ;;  %v1307_v47 = vrot.slane %v1291_v0, %v2058_v18  ;;  %1572 = vst.sshfl [vmem:[%s2898_s4 + $0x6] sm:$0x1 pattern:$0x73625140] %v1291_v0  ;;  %1810 = vmatmul.mubr.bf16.vlgmr.msra.gmra.mrb[12].mxu1 %v1365_v44  ;;  %v1457_v0 = vrot.slane %v1356_v26, 1 }
 0x6eb   :  { %v1454_v43 = vsel %vm127_vm5, %v1453_v40, %v1452_v41 }
 0x6ec   :  { %v1300_v34 = vcombine.high %v1298_v45, %v1298_v45  ;;  %v1314_v48 = vrot.slane %v1298_v45, %v2058_v18  ;;  %v1321_v49 = vrot.slane %v1299_v46, %v2058_v18  ;;  %v1329_v50 = vcombine.high %v1307_v47, %v1307_v47  ;;  %1573 = vst.sshfl [vmem:[%s2898_s4 + $0xe] sm:$0x1 pattern:$0x73625140] %v1299_v46 }
 0x6ed   :  { %1574 = vst.sshfl [vmem:[%s2898_s4 + $0x26] sm:$0x1 pattern:$0x73625140] %v1298_v45  ;;  %v1456_v44 = vsel %vm130_vm6, %v1455_v42, %v1454_v43 }
 0x6ee   :  { %v1328_v51 = vrot.slane %v1300_v34, %v2058_v18  ;;  %v1330_v52 = vcombine.high %v1314_v48, %v1314_v48  ;;  %v1331_v54 = vcombine.high %v1321_v49, %v1321_v49  ;;  %1343 = vst [vmem:[%s2898_s4 + $0x16] sm:$0x1] %v1329_v50  ;;  %1575 = vst.sshfl [vmem:[%s2898_s4 + $0x2e] sm:$0x1 pattern:$0x73625140] %v1300_v34 }
 0x6ef   :  { %v1458_v46 = vsel %vm133_vm7, %v1457_v0, %v1456_v44 }
 0x6f0   :  { %v1332_v55 = vcombine.high %v1328_v51, %v1328_v51  ;;  %1344 = vst [vmem:[%s2898_s4 + $0x1e] sm:$0x1] %v1331_v54  ;;  %1347 = vst [vmem:[%s2898_s4 + $0x36] sm:$0x1] %v1330_v52 }
 0x6f2   :  { %1348 = vst [vmem:[%s2898_s4 + $0x3e] sm:$0x1] %v1332_v55 }
 0x7bd   :  { %v1423_v25 = vpop.f32.mrb[12].mxu1 }
 0x7be   :  { %v1424_v9 = vadd.f32 %v1423_v25, %v1387_v53  ;;  %v1811_v1 = vpop.f32.mrb[13].mxu1 }
 0x7bf   :  { %v1426_v27 = vpop.f32.mrb[14].mxu1 }
 0x7c0   :  { %v1576_v29 = vmul.f32 -1.442695, %v1424_v9  ;;  %v1812_v2 = vpop.f32.mrb[15].mxu1 }
 0x7c2   :  { %1852 = vpow2.f32 %v1576_v29 }
 0x7cc   :  { %v1853_v32 = vpop.eup %1852 }
 0x7cd   :  { %v1432_v37 = vadd.f32 1.0, %v1853_v32 }
 0x7cf   :  { %1854 = vrcp.f32 %v1432_v37 }
 0x7d9   :  { %v1855_v45 = vpop.eup %1854 }
 0x7da   :  { %v1435_v47 = vsub.f32 1.0, %v1855_v45  ;;  %v1460_v48 = vmul.f32 %v1855_v45, %v1458_v46 }
 0x7dc   :  { %v1436_v34 = vmul.f32 %v1435_v47, %v2764_v19 }
 0x7de   :  { %v1461_v49 = vadd.f32 %v1460_v48, %v1436_v34 }
 0x7e0   :  { %v1463_v50 = vcombine.high %v1461_v49, %v1461_v49  ;;  %v1470_v51 = vrot.slane %v1461_v49, %v2058_v18 }
 0x7e2   :  { %v1477_v52 = vrot.slane %v1463_v50, %v2058_v18  ;;  %v1478_v54 = vcombine.high %v1470_v51, %v1470_v51  ;;  %v1486_v55 = vrot.slane %v1470_v51, %v2058_v18  ;;  %1577 = vst.sshfl [vmem:[%s2898_s4 + $0x7] sm:$0x1 pattern:$0x73625140] %v1470_v51 }
 0x7e4   :  { %v1479_v56 = vcombine.high %v1477_v52, %v1477_v52  ;;  %v1493_v57 = vrot.slane %v1477_v52, %v2058_v18  ;;  %v1500_v58 = vrot.slane %v1478_v54, %v2058_v18  ;;  %v1508_v19 = vcombine.high %v1486_v55, %v1486_v55  ;;  %1578 = vst.sshfl [vmem:[%s2898_s4 + $0xf] sm:$0x1 pattern:$0x73625140] %v1478_v54 }
 0x7e5   :  { %1579 = vst.sshfl [vmem:[%s2898_s4 + $0x27] sm:$0x1 pattern:$0x73625140] %v1477_v52 }
 0x7e6   :  { %v1507_v59 = vrot.slane %v1479_v56, %v2058_v18  ;;  %v1509_v36 = vcombine.high %v1493_v57, %v1493_v57  ;;  %v1510_v60 = vcombine.high %v1500_v58, %v1500_v58  ;;  %1522 = vst [vmem:[%s2898_s4 + $0x17] sm:$0x1] %v1508_v19  ;;  %1580 = vst.sshfl [vmem:[%s2898_s4 + $0x2f] sm:$0x1 pattern:$0x73625140] %v1479_v56 }
 0x7e8   :  { %v1511_v61 = vcombine.high %v1507_v59, %v1507_v59  ;;  %1523 = vst [vmem:[%s2898_s4 + $0x1f] sm:$0x1] %v1510_v60  ;;  %1526 = vst [vmem:[%s2898_s4 + $0x37] sm:$0x1] %v1509_v36 }
 0x7ea   :  { %1527 = vst [vmem:[%s2898_s4 + $0x3f] sm:$0x1] %v1511_v61 }

</bundles_post_ra>
